<compile_context>
chip_gen: v5e
topology: v5e:2x2
jax: 0.10.0
libtpu: 0.0.40
codegen_flags: <defaults>
</compile_context>

<pallas_src>
import jax
import jax.numpy as jnp
import numpy as np
from jax.experimental import pallas as pl
from jax.experimental.pallas import tpu as pltpu


# (cin, cout, kernel, stride, padding) for the 4 convs in the PyTorch module.
_LAYER_SPECS = [
    (1, 8, (4, 4), (2, 2), (0, 0)),
    (8, 32, (3, 3), (2, 2), (0, 0)),
    (32, 64, (2, 2), (2, 2), (1, 1)),
    (64, 128, (1, 1), (1, 1), (0, 0)),
]


def _out_dim(size, k, s, p):
    return (size + 2 * p - k) // s + 1


def _build_plan(n, h, w):
    """Static per-layer geometry of the fused stack for an (n, cin, h, w) input."""
    plan = []
    for (cin, cout, (kh, kw), (sh, sw), (ph, pw)) in _LAYER_SPECS:
        oh = _out_dim(h, kh, sh, ph)
        ow = _out_dim(w, kw, sw, pw)
        plan.append(dict(n=n, cin=cin, cout=cout, kh=kh, kw=kw, sh=sh, sw=sw,
                         ph=ph, pw=pw, hin=h, win=w, oh=oh, ow=ow))
        h, w = oh, ow
    return plan


def init_params(key):
    """Deterministic params matching nn.Conv2d shapes / default init style."""
    params = []
    for (cin, cout, k, s, p) in _LAYER_SPECS:
        key, k1, k2 = jax.random.split(key, 3)
        fan_in = cin * k[0] * k[1]
        bound = 1.0 / np.sqrt(fan_in)
        w = jax.random.uniform(k1, (cout, cin, k[0], k[1]), jnp.float32, -bound, bound)
        b = jax.random.uniform(k2, (cout,), jnp.float32, -bound, bound)
        params.append((w, b, s, p))
    return params


def pack_params(raw_params, n, h, w):
    """Init-time (hoisted) packing of conv weights/bias into fused-kernel operands."""
    plan = _build_plan(n, h, w)
    consts = []
    for (w_oihw, bias, _, _), g in zip(raw_params, plan):
        w_np = np.asarray(w_oihw, np.float32)          # (Cout, Cin, KH, KW)
        b_np = np.asarray(bias, np.float32)
        r_mats, m_mats = [], []
        for kh in range(g['kh']):
            # Row selector: picks input row ih = oh*sh + kh - ph (zero row == zero pad).
            r = np.zeros((g['n'] * g['oh'], g['n'] * g['hin']), np.float32)
            for nn in range(g['n']):
                for oh in range(g['oh']):
                    ih = oh * g['sh'] + kh - g['ph']
                    if 0 <= ih < g['hin']:
                        r[nn * g['oh'] + oh, nn * g['hin'] + ih] = 1.0
            # Banded weight matrix: does the kw and cin contractions in one GEMM.
            m = np.zeros((g['win'] * g['cin'], g['ow'] * g['cout']), np.float32)
            for ow in range(g['ow']):
                for kw in range(g['kw']):
                    iw = ow * g['sw'] + kw - g['pw']
                    if 0 <= iw < g['win']:
                        m[iw * g['cin']:(iw + 1) * g['cin'],
                          ow * g['cout']:(ow + 1) * g['cout']] = w_np[:, :, kh, kw].T
            r_mats.append(jnp.asarray(r))
            m_mats.append(jnp.asarray(m))
        b_row = jnp.asarray(np.tile(b_np, g['ow'])[None, :])   # (1, OW*Cout)
        consts.append((tuple(r_mats), tuple(m_mats), b_row))
    return tuple(consts)


def _make_fused_kernel(plan):
    """Kernel over refs = (x_ref, *per-layer (R..., M..., bias) refs, out_ref)."""
    def kernel(*refs):
        out_ref = refs[-1]
        x = refs[0][...]                       # (N*H0, W0*C0) activation tile in VMEM
        idx = 1
        for g in plan:
            taps = g['kh']
            r_refs = refs[idx: idx + taps]
            m_refs = refs[idx + taps: idx + 2 * taps]
            b_ref = refs[idx + 2 * taps]
            idx += 2 * taps + 1
            acc = None
            for r_ref, m_ref in zip(r_refs, m_refs):
                # (N*OH, N*Hin) @ (N*Hin, Win*Cin) -> row-gathered activations
                rows = jnp.dot(r_ref[...], x, preferred_element_type=jnp.float32)
                # (N*OH, Win*Cin) @ (Win*Cin, OW*Cout) -> conv contribution of tap kh
                term = jnp.dot(rows, m_ref[...], preferred_element_type=jnp.float32)
                acc = term if acc is None else acc + term
            # Bias folded into the f32 epilogue (broadcast over rows on the VPU).
            x = acc + b_ref[...]               # next layer's input, never leaves VMEM
        out_ref[...] = x                       # (N*4, 4*128): lane-dense store
    return kernel


@jax.jit
def conv_stack_forward(x_nchw, consts):
    n, c, h, w = x_nchw.shape
    plan = _build_plan(n, h, w)
    assert c == plan[0]['cin']
    gl = plan[-1]

    # Single layout change on the way in: NCHW -> row-major NHWC tile (N*H, W*C).
    x2d = jnp.transpose(x_nchw, (0, 2, 3, 1)).reshape(n * h, w * c)

    inputs = [x2d]
    in_specs = [pl.BlockSpec(x2d.shape, lambda i: (0, 0))]
    for (r_mats, m_mats, b_row) in consts:
        for a in (*r_mats, *m_mats, b_row):
            inputs.append(a)
            in_specs.append(pl.BlockSpec(a.shape, lambda i: (0, 0)))

    out_rows = gl['n'] * gl['oh']
    out_cols = gl['ow'] * gl['cout']           # 4*128 = 512: lane-dense output
    out2d = pl.pallas_call(
        _make_fused_kernel(plan),
        out_shape=jax.ShapeDtypeStruct((out_rows, out_cols), jnp.float32),
        grid=(1,),
        in_specs=in_specs,
        out_specs=pl.BlockSpec((out_rows, out_cols), lambda i: (0, 0)),
        compiler_params=pltpu.CompilerParams(dimension_semantics=("arbitrary",)),
    )(*inputs)

    # Single layout change on the way out: (N*OH, OW*Cout) -> NCHW.
    out = out2d.reshape(n, gl['oh'], gl['ow'], gl['cout'])
    return jnp.transpose(out, (0, 3, 1, 2))


def conv_stack_reference(x, raw_params):
    for (w, b, s, p) in raw_params:
        x = jax.lax.conv_general_dilated(
            x, w, window_strides=s,
            padding=[(p[0], p[0]), (p[1], p[1])],
            dimension_numbers=("NCHW", "OIHW", "NCHW"))
        x = x + b.reshape(1, -1, 1, 1)
    return x


if __name__ == "__main__":
    key = jax.random.PRNGKey(0)
    key, xk = jax.random.split(key)
    # NCHW input, 1 channel (as required by the first conv).
    x = jax.random.normal(xk, (2, 1, 32, 32), jnp.float32)

    raw_params = init_params(key)
    consts = pack_params(raw_params, x.shape[0], x.shape[2], x.shape[3])

    out = jax.block_until_ready(conv_stack_forward(x, consts))
    ref = jax.block_until_ready(conv_stack_reference(x, raw_params))

    assert out.shape == (2, 128, 4, 4), out.shape
    assert np.allclose(np.asarray(out), np.asarray(ref), atol=1e-4, rtol=1e-4)
    print("KERNEL_OK")
</pallas_src>

<mosaic_0001>
module attributes {stable_mosaic.version = 11 : i64} {
  func.func @kernel(%arg0: i32, %arg1: memref<64x32xf32, #tpu.memory_space<vmem>>, %arg2: memref<30x64xf32, #tpu.memory_space<vmem>>, %arg3: memref<30x64xf32, #tpu.memory_space<vmem>>, %arg4: memref<30x64xf32, #tpu.memory_space<vmem>>, %arg5: memref<30x64xf32, #tpu.memory_space<vmem>>, %arg6: memref<32x120xf32, #tpu.memory_space<vmem>>, %arg7: memref<32x120xf32, #tpu.memory_space<vmem>>, %arg8: memref<32x120xf32, #tpu.memory_space<vmem>>, %arg9: memref<32x120xf32, #tpu.memory_space<vmem>>, %arg10: memref<1x120xf32, #tpu.memory_space<vmem>>, %arg11: memref<14x30xf32, #tpu.memory_space<vmem>>, %arg12: memref<14x30xf32, #tpu.memory_space<vmem>>, %arg13: memref<14x30xf32, #tpu.memory_space<vmem>>, %arg14: memref<120x224xf32, #tpu.memory_space<vmem>>, %arg15: memref<120x224xf32, #tpu.memory_space<vmem>>, %arg16: memref<120x224xf32, #tpu.memory_space<vmem>>, %arg17: memref<1x224xf32, #tpu.memory_space<vmem>>, %arg18: memref<8x14xf32, #tpu.memory_space<vmem>>, %arg19: memref<8x14xf32, #tpu.memory_space<vmem>>, %arg20: memref<224x256xf32, #tpu.memory_space<vmem>>, %arg21: memref<224x256xf32, #tpu.memory_space<vmem>>, %arg22: memref<1x256xf32, #tpu.memory_space<vmem>>, %arg23: memref<8x8xf32, #tpu.memory_space<vmem>>, %arg24: memref<256x512xf32, #tpu.memory_space<vmem>>, %arg25: memref<1x512xf32, #tpu.memory_space<vmem>>, %arg26: memref<8x512xf32, #tpu.memory_space<vmem>>) attributes {dimension_semantics = [#tpu.dimension_semantics<arbitrary>], iteration_bounds = array<i64: 1>, scalar_prefetch = 0 : i64, scratch_operands = 0 : i64, tpu.core_type = #tpu.core_type<tc>, window_params = [{pipeline_mode = #tpu.pipeline_mode<synchronous>, transform_indices = @transform_0, window_bounds = array<i64: 64, 32>}, {pipeline_mode = #tpu.pipeline_mode<synchronous>, transform_indices = @transform_1, window_bounds = array<i64: 30, 64>}, {pipeline_mode = #tpu.pipeline_mode<synchronous>, transform_indices = @transform_2, window_bounds = array<i64: 30, 64>}, {pipeline_mode = #tpu.pipeline_mode<synchronous>, transform_indices = @transform_3, window_bounds = array<i64: 30, 64>}, {pipeline_mode = #tpu.pipeline_mode<synchronous>, transform_indices = @transform_4, window_bounds = array<i64: 30, 64>}, {pipeline_mode = #tpu.pipeline_mode<synchronous>, transform_indices = @transform_5, window_bounds = array<i64: 32, 120>}, {pipeline_mode = #tpu.pipeline_mode<synchronous>, transform_indices = @transform_6, window_bounds = array<i64: 32, 120>}, {pipeline_mode = #tpu.pipeline_mode<synchronous>, transform_indices = @transform_7, window_bounds = array<i64: 32, 120>}, {pipeline_mode = #tpu.pipeline_mode<synchronous>, transform_indices = @transform_8, window_bounds = array<i64: 32, 120>}, {pipeline_mode = #tpu.pipeline_mode<synchronous>, transform_indices = @transform_9, window_bounds = array<i64: 1, 120>}, {pipeline_mode = #tpu.pipeline_mode<synchronous>, transform_indices = @transform_10, window_bounds = array<i64: 14, 30>}, {pipeline_mode = #tpu.pipeline_mode<synchronous>, transform_indices = @transform_11, window_bounds = array<i64: 14, 30>}, {pipeline_mode = #tpu.pipeline_mode<synchronous>, transform_indices = @transform_12, window_bounds = array<i64: 14, 30>}, {pipeline_mode = #tpu.pipeline_mode<synchronous>, transform_indices = @transform_13, window_bounds = array<i64: 120, 224>}, {pipeline_mode = #tpu.pipeline_mode<synchronous>, transform_indices = @transform_14, window_bounds = array<i64: 120, 224>}, {pipeline_mode = #tpu.pipeline_mode<synchronous>, transform_indices = @transform_15, window_bounds = array<i64: 120, 224>}, {pipeline_mode = #tpu.pipeline_mode<synchronous>, transform_indices = @transform_16, window_bounds = array<i64: 1, 224>}, {pipeline_mode = #tpu.pipeline_mode<synchronous>, transform_indices = @transform_17, window_bounds = array<i64: 8, 14>}, {pipeline_mode = #tpu.pipeline_mode<synchronous>, transform_indices = @transform_18, window_bounds = array<i64: 8, 14>}, {pipeline_mode = #tpu.pipeline_mode<synchronous>, transform_indices = @transform_19, window_bounds = array<i64: 224, 256>}, {pipeline_mode = #tpu.pipeline_mode<synchronous>, transform_indices = @transform_20, window_bounds = array<i64: 224, 256>}, {pipeline_mode = #tpu.pipeline_mode<synchronous>, transform_indices = @transform_21, window_bounds = array<i64: 1, 256>}, {pipeline_mode = #tpu.pipeline_mode<synchronous>, transform_indices = @transform_22, window_bounds = array<i64: 8, 8>}, {pipeline_mode = #tpu.pipeline_mode<synchronous>, transform_indices = @transform_23, window_bounds = array<i64: 256, 512>}, {pipeline_mode = #tpu.pipeline_mode<synchronous>, transform_indices = @transform_24, window_bounds = array<i64: 1, 512>}, {pipeline_mode = #tpu.pipeline_mode<synchronous>, transform_indices = @transform_25, window_bounds = array<i64: 8, 512>}]} {
    %c0 = arith.constant 0 : index
    %c0_0 = arith.constant 0 : index
    %0 = vector.load %arg1[%c0, %c0_0] : memref<64x32xf32, #tpu.memory_space<vmem>>, vector<64x32xf32>
    %c0_1 = arith.constant 0 : index
    %c0_2 = arith.constant 0 : index
    %1 = vector.load %arg2[%c0_1, %c0_2] : memref<30x64xf32, #tpu.memory_space<vmem>>, vector<30x64xf32>
    %cst = arith.constant dense<0.000000e+00> : vector<30x32xf32>
    %2 = tpu.matmul %1, %0, %cst {dimension_numbers = #tpu.dot_dimension_numbers<[1], [0], [0], [1], [0, 0, 1, 1], [], []>} : vector<30x64xf32>, vector<64x32xf32>, vector<30x32xf32> -> vector<30x32xf32>
    %c0_3 = arith.constant 0 : index
    %c0_4 = arith.constant 0 : index
    %3 = vector.load %arg6[%c0_3, %c0_4] : memref<32x120xf32, #tpu.memory_space<vmem>>, vector<32x120xf32>
    %cst_5 = arith.constant dense<0.000000e+00> : vector<30x120xf32>
    %4 = tpu.matmul %2, %3, %cst_5 {dimension_numbers = #tpu.dot_dimension_numbers<[1], [0], [0], [1], [0, 0, 1, 1], [], []>} : vector<30x32xf32>, vector<32x120xf32>, vector<30x120xf32> -> vector<30x120xf32>
    %c0_6 = arith.constant 0 : index
    %c0_7 = arith.constant 0 : index
    %5 = vector.load %arg3[%c0_6, %c0_7] : memref<30x64xf32, #tpu.memory_space<vmem>>, vector<30x64xf32>
    %cst_8 = arith.constant dense<0.000000e+00> : vector<30x32xf32>
    %6 = tpu.matmul %5, %0, %cst_8 {dimension_numbers = #tpu.dot_dimension_numbers<[1], [0], [0], [1], [0, 0, 1, 1], [], []>} : vector<30x64xf32>, vector<64x32xf32>, vector<30x32xf32> -> vector<30x32xf32>
    %c0_9 = arith.constant 0 : index
    %c0_10 = arith.constant 0 : index
    %7 = vector.load %arg7[%c0_9, %c0_10] : memref<32x120xf32, #tpu.memory_space<vmem>>, vector<32x120xf32>
    %cst_11 = arith.constant dense<0.000000e+00> : vector<30x120xf32>
    %8 = tpu.matmul %6, %7, %cst_11 {dimension_numbers = #tpu.dot_dimension_numbers<[1], [0], [0], [1], [0, 0, 1, 1], [], []>} : vector<30x32xf32>, vector<32x120xf32>, vector<30x120xf32> -> vector<30x120xf32>
    %9 = arith.addf %4, %8 : vector<30x120xf32>
    %c0_12 = arith.constant 0 : index
    %c0_13 = arith.constant 0 : index
    %10 = vector.load %arg4[%c0_12, %c0_13] : memref<30x64xf32, #tpu.memory_space<vmem>>, vector<30x64xf32>
    %cst_14 = arith.constant dense<0.000000e+00> : vector<30x32xf32>
    %11 = tpu.matmul %10, %0, %cst_14 {dimension_numbers = #tpu.dot_dimension_numbers<[1], [0], [0], [1], [0, 0, 1, 1], [], []>} : vector<30x64xf32>, vector<64x32xf32>, vector<30x32xf32> -> vector<30x32xf32>
    %c0_15 = arith.constant 0 : index
    %c0_16 = arith.constant 0 : index
    %12 = vector.load %arg8[%c0_15, %c0_16] : memref<32x120xf32, #tpu.memory_space<vmem>>, vector<32x120xf32>
    %cst_17 = arith.constant dense<0.000000e+00> : vector<30x120xf32>
    %13 = tpu.matmul %11, %12, %cst_17 {dimension_numbers = #tpu.dot_dimension_numbers<[1], [0], [0], [1], [0, 0, 1, 1], [], []>} : vector<30x32xf32>, vector<32x120xf32>, vector<30x120xf32> -> vector<30x120xf32>
    %14 = arith.addf %9, %13 : vector<30x120xf32>
    %c0_18 = arith.constant 0 : index
    %c0_19 = arith.constant 0 : index
    %15 = vector.load %arg5[%c0_18, %c0_19] : memref<30x64xf32, #tpu.memory_space<vmem>>, vector<30x64xf32>
    %cst_20 = arith.constant dense<0.000000e+00> : vector<30x32xf32>
    %16 = tpu.matmul %15, %0, %cst_20 {dimension_numbers = #tpu.dot_dimension_numbers<[1], [0], [0], [1], [0, 0, 1, 1], [], []>} : vector<30x64xf32>, vector<64x32xf32>, vector<30x32xf32> -> vector<30x32xf32>
    %c0_21 = arith.constant 0 : index
    %c0_22 = arith.constant 0 : index
    %17 = vector.load %arg9[%c0_21, %c0_22] : memref<32x120xf32, #tpu.memory_space<vmem>>, vector<32x120xf32>
    %cst_23 = arith.constant dense<0.000000e+00> : vector<30x120xf32>
    %18 = tpu.matmul %16, %17, %cst_23 {dimension_numbers = #tpu.dot_dimension_numbers<[1], [0], [0], [1], [0, 0, 1, 1], [], []>} : vector<30x32xf32>, vector<32x120xf32>, vector<30x120xf32> -> vector<30x120xf32>
    %19 = arith.addf %14, %18 : vector<30x120xf32>
    %c0_24 = arith.constant 0 : index
    %c0_25 = arith.constant 0 : index
    %20 = vector.load %arg10[%c0_24, %c0_25] : memref<1x120xf32, #tpu.memory_space<vmem>>, vector<1x120xf32>
    %21 = vector.broadcast %20 : vector<1x120xf32> to vector<30x120xf32>
    %22 = arith.addf %19, %21 : vector<30x120xf32>
    %c0_26 = arith.constant 0 : index
    %c0_27 = arith.constant 0 : index
    %23 = vector.load %arg11[%c0_26, %c0_27] : memref<14x30xf32, #tpu.memory_space<vmem>>, vector<14x30xf32>
    %cst_28 = arith.constant dense<0.000000e+00> : vector<14x120xf32>
    %24 = tpu.matmul %23, %22, %cst_28 {dimension_numbers = #tpu.dot_dimension_numbers<[1], [0], [0], [1], [0, 0, 1, 1], [], []>} : vector<14x30xf32>, vector<30x120xf32>, vector<14x120xf32> -> vector<14x120xf32>
    %c0_29 = arith.constant 0 : index
    %c0_30 = arith.constant 0 : index
    %25 = vector.load %arg14[%c0_29, %c0_30] : memref<120x224xf32, #tpu.memory_space<vmem>>, vector<120x224xf32>
    %cst_31 = arith.constant dense<0.000000e+00> : vector<14x224xf32>
    %26 = tpu.matmul %24, %25, %cst_31 {dimension_numbers = #tpu.dot_dimension_numbers<[1], [0], [0], [1], [0, 0, 1, 1], [], []>} : vector<14x120xf32>, vector<120x224xf32>, vector<14x224xf32> -> vector<14x224xf32>
    %c0_32 = arith.constant 0 : index
    %c0_33 = arith.constant 0 : index
    %27 = vector.load %arg12[%c0_32, %c0_33] : memref<14x30xf32, #tpu.memory_space<vmem>>, vector<14x30xf32>
    %cst_34 = arith.constant dense<0.000000e+00> : vector<14x120xf32>
    %28 = tpu.matmul %27, %22, %cst_34 {dimension_numbers = #tpu.dot_dimension_numbers<[1], [0], [0], [1], [0, 0, 1, 1], [], []>} : vector<14x30xf32>, vector<30x120xf32>, vector<14x120xf32> -> vector<14x120xf32>
    %c0_35 = arith.constant 0 : index
    %c0_36 = arith.constant 0 : index
    %29 = vector.load %arg15[%c0_35, %c0_36] : memref<120x224xf32, #tpu.memory_space<vmem>>, vector<120x224xf32>
    %cst_37 = arith.constant dense<0.000000e+00> : vector<14x224xf32>
    %30 = tpu.matmul %28, %29, %cst_37 {dimension_numbers = #tpu.dot_dimension_numbers<[1], [0], [0], [1], [0, 0, 1, 1], [], []>} : vector<14x120xf32>, vector<120x224xf32>, vector<14x224xf32> -> vector<14x224xf32>
    %31 = arith.addf %26, %30 : vector<14x224xf32>
    %c0_38 = arith.constant 0 : index
    %c0_39 = arith.constant 0 : index
    %32 = vector.load %arg13[%c0_38, %c0_39] : memref<14x30xf32, #tpu.memory_space<vmem>>, vector<14x30xf32>
    %cst_40 = arith.constant dense<0.000000e+00> : vector<14x120xf32>
    %33 = tpu.matmul %32, %22, %cst_40 {dimension_numbers = #tpu.dot_dimension_numbers<[1], [0], [0], [1], [0, 0, 1, 1], [], []>} : vector<14x30xf32>, vector<30x120xf32>, vector<14x120xf32> -> vector<14x120xf32>
    %c0_41 = arith.constant 0 : index
    %c0_42 = arith.constant 0 : index
    %34 = vector.load %arg16[%c0_41, %c0_42] : memref<120x224xf32, #tpu.memory_space<vmem>>, vector<120x224xf32>
    %cst_43 = arith.constant dense<0.000000e+00> : vector<14x224xf32>
    %35 = tpu.matmul %33, %34, %cst_43 {dimension_numbers = #tpu.dot_dimension_numbers<[1], [0], [0], [1], [0, 0, 1, 1], [], []>} : vector<14x120xf32>, vector<120x224xf32>, vector<14x224xf32> -> vector<14x224xf32>
    %36 = arith.addf %31, %35 : vector<14x224xf32>
    %c0_44 = arith.constant 0 : index
    %c0_45 = arith.constant 0 : index
    %37 = vector.load %arg17[%c0_44, %c0_45] : memref<1x224xf32, #tpu.memory_space<vmem>>, vector<1x224xf32>
    %38 = vector.broadcast %37 : vector<1x224xf32> to vector<14x224xf32>
    %39 = arith.addf %36, %38 : vector<14x224xf32>
    %c0_46 = arith.constant 0 : index
    %c0_47 = arith.constant 0 : index
    %40 = vector.load %arg18[%c0_46, %c0_47] : memref<8x14xf32, #tpu.memory_space<vmem>>, vector<8x14xf32>
    %cst_48 = arith.constant dense<0.000000e+00> : vector<8x224xf32>
    %41 = tpu.matmul %40, %39, %cst_48 {dimension_numbers = #tpu.dot_dimension_numbers<[1], [0], [0], [1], [0, 0, 1, 1], [], []>} : vector<8x14xf32>, vector<14x224xf32>, vector<8x224xf32> -> vector<8x224xf32>
    %c0_49 = arith.constant 0 : index
    %c0_50 = arith.constant 0 : index
    %42 = vector.load %arg20[%c0_49, %c0_50] : memref<224x256xf32, #tpu.memory_space<vmem>>, vector<224x256xf32>
    %cst_51 = arith.constant dense<0.000000e+00> : vector<8x256xf32>
    %43 = tpu.matmul %41, %42, %cst_51 {dimension_numbers = #tpu.dot_dimension_numbers<[1], [0], [0], [1], [0, 0, 1, 1], [], []>} : vector<8x224xf32>, vector<224x256xf32>, vector<8x256xf32> -> vector<8x256xf32>
    %c0_52 = arith.constant 0 : index
    %c0_53 = arith.constant 0 : index
    %44 = vector.load %arg19[%c0_52, %c0_53] : memref<8x14xf32, #tpu.memory_space<vmem>>, vector<8x14xf32>
    %cst_54 = arith.constant dense<0.000000e+00> : vector<8x224xf32>
    %45 = tpu.matmul %44, %39, %cst_54 {dimension_numbers = #tpu.dot_dimension_numbers<[1], [0], [0], [1], [0, 0, 1, 1], [], []>} : vector<8x14xf32>, vector<14x224xf32>, vector<8x224xf32> -> vector<8x224xf32>
    %c0_55 = arith.constant 0 : index
    %c0_56 = arith.constant 0 : index
    %46 = vector.load %arg21[%c0_55, %c0_56] : memref<224x256xf32, #tpu.memory_space<vmem>>, vector<224x256xf32>
    %cst_57 = arith.constant dense<0.000000e+00> : vector<8x256xf32>
    %47 = tpu.matmul %45, %46, %cst_57 {dimension_numbers = #tpu.dot_dimension_numbers<[1], [0], [0], [1], [0, 0, 1, 1], [], []>} : vector<8x224xf32>, vector<224x256xf32>, vector<8x256xf32> -> vector<8x256xf32>
    %48 = arith.addf %43, %47 : vector<8x256xf32>
    %c0_58 = arith.constant 0 : index
    %c0_59 = arith.constant 0 : index
    %49 = vector.load %arg22[%c0_58, %c0_59] : memref<1x256xf32, #tpu.memory_space<vmem>>, vector<1x256xf32>
    %50 = vector.broadcast %49 : vector<1x256xf32> to vector<8x256xf32>
    %51 = arith.addf %48, %50 : vector<8x256xf32>
    %c0_60 = arith.constant 0 : index
    %c0_61 = arith.constant 0 : index
    %52 = vector.load %arg23[%c0_60, %c0_61] : memref<8x8xf32, #tpu.memory_space<vmem>>, vector<8x8xf32>
    %cst_62 = arith.constant dense<0.000000e+00> : vector<8x256xf32>
    %53 = tpu.matmul %52, %51, %cst_62 {dimension_numbers = #tpu.dot_dimension_numbers<[1], [0], [0], [1], [0, 0, 1, 1], [], []>} : vector<8x8xf32>, vector<8x256xf32>, vector<8x256xf32> -> vector<8x256xf32>
    %c0_63 = arith.constant 0 : index
    %c0_64 = arith.constant 0 : index
    %54 = vector.load %arg24[%c0_63, %c0_64] : memref<256x512xf32, #tpu.memory_space<vmem>>, vector<256x512xf32>
    %cst_65 = arith.constant dense<0.000000e+00> : vector<8x512xf32>
    %55 = tpu.matmul %53, %54, %cst_65 {dimension_numbers = #tpu.dot_dimension_numbers<[1], [0], [0], [1], [0, 0, 1, 1], [], []>} : vector<8x256xf32>, vector<256x512xf32>, vector<8x512xf32> -> vector<8x512xf32>
    %c0_66 = arith.constant 0 : index
    %c0_67 = arith.constant 0 : index
    %56 = vector.load %arg25[%c0_66, %c0_67] : memref<1x512xf32, #tpu.memory_space<vmem>>, vector<1x512xf32>
    %57 = vector.broadcast %56 : vector<1x512xf32> to vector<8x512xf32>
    %58 = arith.addf %55, %57 : vector<8x512xf32>
    %c0_68 = arith.constant 0 : index
    %c0_69 = arith.constant 0 : index
    %59 = vector.load %arg26[%c0_68, %c0_69] : memref<8x512xf32, #tpu.memory_space<vmem>>, vector<8x512xf32>
    tpu.vector_store %arg26[%c0_68, %c0_69], %58 {strides = array<i32>} : memref<8x512xf32, #tpu.memory_space<vmem>>, vector<8x512xf32>,
    return
  }
  func.func @transform_0(%arg0: i32) -> (i32, i32) {
    %c0_i32 = arith.constant 0 : i32
    %c0_i32_0 = arith.constant 0 : i32
    %c0_i32_1 = arith.constant 0 : i32
    return %c0_i32, %c0_i32_0 : i32, i32
  }
  func.func @transform_1(%arg0: i32) -> (i32, i32) {
    %c0_i32 = arith.constant 0 : i32
    %c0_i32_0 = arith.constant 0 : i32
    %c0_i32_1 = arith.constant 0 : i32
    return %c0_i32, %c0_i32_0 : i32, i32
  }
  func.func @transform_2(%arg0: i32) -> (i32, i32) {
    %c0_i32 = arith.constant 0 : i32
    %c0_i32_0 = arith.constant 0 : i32
    %c0_i32_1 = arith.constant 0 : i32
    return %c0_i32, %c0_i32_0 : i32, i32
  }
  func.func @transform_3(%arg0: i32) -> (i32, i32) {
    %c0_i32 = arith.constant 0 : i32
    %c0_i32_0 = arith.constant 0 : i32
    %c0_i32_1 = arith.constant 0 : i32
    return %c0_i32, %c0_i32_0 : i32, i32
  }
  func.func @transform_4(%arg0: i32) -> (i32, i32) {
    %c0_i32 = arith.constant 0 : i32
    %c0_i32_0 = arith.constant 0 : i32
    %c0_i32_1 = arith.constant 0 : i32
    return %c0_i32, %c0_i32_0 : i32, i32
  }
  func.func @transform_5(%arg0: i32) -> (i32, i32) {
    %c0_i32 = arith.constant 0 : i32
    %c0_i32_0 = arith.constant 0 : i32
    %c0_i32_1 = arith.constant 0 : i32
    return %c0_i32, %c0_i32_0 : i32, i32
  }
  func.func @transform_6(%arg0: i32) -> (i32, i32) {
    %c0_i32 = arith.constant 0 : i32
    %c0_i32_0 = arith.constant 0 : i32
    %c0_i32_1 = arith.constant 0 : i32
    return %c0_i32, %c0_i32_0 : i32, i32
  }
  func.func @transform_7(%arg0: i32) -> (i32, i32) {
    %c0_i32 = arith.constant 0 : i32
    %c0_i32_0 = arith.constant 0 : i32
    %c0_i32_1 = arith.constant 0 : i32
    return %c0_i32, %c0_i32_0 : i32, i32
  }
  func.func @transform_8(%arg0: i32) -> (i32, i32) {
    %c0_i32 = arith.constant 0 : i32
    %c0_i32_0 = arith.constant 0 : i32
    %c0_i32_1 = arith.constant 0 : i32
    return %c0_i32, %c0_i32_0 : i32, i32
  }
  func.func @transform_9(%arg0: i32) -> (i32, i32) {
    %c0_i32 = arith.constant 0 : i32
    %c0_i32_0 = arith.constant 0 : i32
    %c0_i32_1 = arith.constant 0 : i32
    return %c0_i32, %c0_i32_0 : i32, i32
  }
  func.func @transform_10(%arg0: i32) -> (i32, i32) {
    %c0_i32 = arith.constant 0 : i32
    %c0_i32_0 = arith.constant 0 : i32
    %c0_i32_1 = arith.constant 0 : i32
    return %c0_i32, %c0_i32_0 : i32, i32
  }
  func.func @transform_11(%arg0: i32) -> (i32, i32) {
    %c0_i32 = arith.constant 0 : i32
    %c0_i32_0 = arith.constant 0 : i32
    %c0_i32_1 = arith.constant 0 : i32
    return %c0_i32, %c0_i32_0 : i32, i32
  }
  func.func @transform_12(%arg0: i32) -> (i32, i32) {
    %c0_i32 = arith.constant 0 : i32
    %c0_i32_0 = arith.constant 0 : i32
    %c0_i32_1 = arith.constant 0 : i32
    return %c0_i32, %c0_i32_0 : i32, i32
  }
  func.func @transform_13(%arg0: i32) -> (i32, i32) {
    %c0_i32 = arith.constant 0 : i32
    %c0_i32_0 = arith.constant 0 : i32
    %c0_i32_1 = arith.constant 0 : i32
    return %c0_i32, %c0_i32_0 : i32, i32
  }
  func.func @transform_14(%arg0: i32) -> (i32, i32) {
    %c0_i32 = arith.constant 0 : i32
    %c0_i32_0 = arith.constant 0 : i32
    %c0_i32_1 = arith.constant 0 : i32
    return %c0_i32, %c0_i32_0 : i32, i32
  }
  func.func @transform_15(%arg0: i32) -> (i32, i32) {
    %c0_i32 = arith.constant 0 : i32
    %c0_i32_0 = arith.constant 0 : i32
    %c0_i32_1 = arith.constant 0 : i32
    return %c0_i32, %c0_i32_0 : i32, i32
  }
  func.func @transform_16(%arg0: i32) -> (i32, i32) {
    %c0_i32 = arith.constant 0 : i32
    %c0_i32_0 = arith.constant 0 : i32
    %c0_i32_1 = arith.constant 0 : i32
    return %c0_i32, %c0_i32_0 : i32, i32
  }
  func.func @transform_17(%arg0: i32) -> (i32, i32) {
    %c0_i32 = arith.constant 0 : i32
    %c0_i32_0 = arith.constant 0 : i32
    %c0_i32_1 = arith.constant 0 : i32
    return %c0_i32, %c0_i32_0 : i32, i32
  }
  func.func @transform_18(%arg0: i32) -> (i32, i32) {
    %c0_i32 = arith.constant 0 : i32
    %c0_i32_0 = arith.constant 0 : i32
    %c0_i32_1 = arith.constant 0 : i32
    return %c0_i32, %c0_i32_0 : i32, i32
  }
  func.func @transform_19(%arg0: i32) -> (i32, i32) {
    %c0_i32 = arith.constant 0 : i32
    %c0_i32_0 = arith.constant 0 : i32
    %c0_i32_1 = arith.constant 0 : i32
    return %c0_i32, %c0_i32_0 : i32, i32
  }
  func.func @transform_20(%arg0: i32) -> (i32, i32) {
    %c0_i32 = arith.constant 0 : i32
    %c0_i32_0 = arith.constant 0 : i32
    %c0_i32_1 = arith.constant 0 : i32
    return %c0_i32, %c0_i32_0 : i32, i32
  }
  func.func @transform_21(%arg0: i32) -> (i32, i32) {
    %c0_i32 = arith.constant 0 : i32
    %c0_i32_0 = arith.constant 0 : i32
    %c0_i32_1 = arith.constant 0 : i32
    return %c0_i32, %c0_i32_0 : i32, i32
  }
  func.func @transform_22(%arg0: i32) -> (i32, i32) {
    %c0_i32 = arith.constant 0 : i32
    %c0_i32_0 = arith.constant 0 : i32
    %c0_i32_1 = arith.constant 0 : i32
    return %c0_i32, %c0_i32_0 : i32, i32
  }
  func.func @transform_23(%arg0: i32) -> (i32, i32) {
    %c0_i32 = arith.constant 0 : i32
    %c0_i32_0 = arith.constant 0 : i32
    %c0_i32_1 = arith.constant 0 : i32
    return %c0_i32, %c0_i32_0 : i32, i32
  }
  func.func @transform_24(%arg0: i32) -> (i32, i32) {
    %c0_i32 = arith.constant 0 : i32
    %c0_i32_0 = arith.constant 0 : i32
    %c0_i32_1 = arith.constant 0 : i32
    return %c0_i32, %c0_i32_0 : i32, i32
  }
  func.func @transform_25(%arg0: i32) -> (i32, i32) {
    %c0_i32 = arith.constant 0 : i32
    %c0_i32_0 = arith.constant 0 : i32
    %c0_i32_1 = arith.constant 0 : i32
    return %c0_i32, %c0_i32_0 : i32, i32
  }
}

</mosaic_0001>

<bundles_post_ra>
// kernel: conv_stack_forward.1
= control target key start
LH: loop header
LB: loop body
LE: loop exit
PB: predicated region body
PF: predicated region fallthrough
CT: control target
= control target key end

     0   :  { %s3204_s0 = inlined_call_operand.hbm [shape: f32[64,32], index: 0, kind: input, shape index: {}]   ;;  %s3205_s1 = inlined_call_operand.vmem [shape: f32[30,64], index: 1, kind: input, shape index: {}]   ;;  %s3206_s2 = inlined_call_operand.hbm [shape: f32[30,64], index: 2, kind: input, shape index: {}]   ;;  %s3207_s3 = inlined_call_operand.hbm [shape: f32[30,64], index: 3, kind: input, shape index: {}]   ;;  %s3208_s4 = inlined_call_operand.hbm [shape: f32[30,64], index: 4, kind: input, shape index: {}]   ;;  %s3209_s5 = inlined_call_operand.hbm [shape: f32[32,120], index: 5, kind: input, shape index: {}]   ;;  %s3210_s6 = inlined_call_operand.hbm [shape: f32[32,120], index: 6, kind: input, shape index: {}]   ;;  %s3211_s7 = inlined_call_operand.hbm [shape: f32[32,120], index: 7, kind: input, shape index: {}]   ;;  %s3212_s8 = inlined_call_operand.hbm [shape: f32[32,120], index: 8, kind: input, shape index: {}]   ;;  %s3213_s9 = inlined_call_operand.hbm [shape: f32[1,120], index: 9, kind: input, shape index: {}]   ;;  %s3214_s10 = inlined_call_operand.vmem [shape: f32[14,30], index: 10, kind: input, shape index: {}]   ;;  %s3215_s11 = inlined_call_operand.hbm [shape: f32[14,30], index: 11, kind: input, shape index: {}]   ;;  %s3216_s12 = inlined_call_operand.hbm [shape: f32[14,30], index: 12, kind: input, shape index: {}]   ;;  %s3217_s13 = inlined_call_operand.vmem [shape: f32[120,224], index: 13, kind: input, shape index: {}]   ;;  %s3218_s14 = inlined_call_operand.vmem [shape: f32[120,224], index: 14, kind: input, shape index: {}]   ;;  %s3219_s15 = inlined_call_operand.vmem [shape: f32[120,224], index: 15, kind: input, shape index: {}]   ;;  %s3220_s16 = inlined_call_operand.vmem [shape: f32[1,224], index: 16, kind: input, shape index: {}]   ;;  %s3221_s17 = inlined_call_operand.vmem [shape: f32[8,14], index: 17, kind: input, shape index: {}]   ;;  %s3222_s18 = inlined_call_operand.hbm [shape: f32[8,14], index: 18, kind: input, shape index: {}]   ;;  %s3223_s19 = inlined_call_operand.vmem [shape: f32[224,256], index: 19, kind: input, shape index: {}]   ;;  %s3224_s20 = inlined_call_operand.vmem [shape: f32[224,256], index: 20, kind: input, shape index: {}]   ;;  %s3225_s21 = inlined_call_operand.hbm [shape: f32[1,256], index: 21, kind: input, shape index: {}]   ;;  %s3226_s22 = inlined_call_operand.hbm [shape: f32[8,8], index: 22, kind: input, shape index: {}]   ;;  %s3227_s23 = inlined_call_operand.hbm [shape: f32[256,512], index: 23, kind: input, shape index: {}]   ;;  %s3228_s24 = inlined_call_operand.vmem [shape: f32[1,512], index: 24, kind: input, shape index: {}]   ;;  %s3229_s25 = inlined_call_operand.vmem [shape: f32[8,512], index: 25, kind: output, shape index: {}]  }
   0x1   :  { %3232 = sst [smem:[#allocation33_spill]] %s3204_s0 }
   0x2   :  { %3233 = sst [smem:[#allocation34_spill]] %s3205_s1 }
   0x3   :  { %3234 = sst [smem:[#allocation35_spill]] %s3206_s2 }
   0x4   :  { %3235 = sst [smem:[#allocation36_spill]] %s3207_s3 }
   0x5   :  { %3236 = sst [smem:[#allocation37_spill]] %s3208_s4 }
   0x6   :  { %3237 = sst [smem:[#allocation38_spill]] %s3209_s5 }
   0x7   :  { %3238 = sst [smem:[#allocation39_spill]] %s3210_s6 }
   0x8   :  { %3239 = sst [smem:[#allocation40_spill]] %s3211_s7 }
   0x9   :  { %3240 = sst [smem:[#allocation41_spill]] %s3212_s8 }
   0xa   :  { %3241 = sst [smem:[#allocation42_spill]] %s3213_s9 }
   0xb   :  { %3242 = sst [smem:[#allocation43_spill]] %s3228_s24 }
   0xc   :  { %3243 = sst [smem:[#allocation44_spill]] %s3229_s25 }
   0xd   :  { %30 = vsyncpa [#allocation3], 0 }
   0xe   :  { %31 = vsyncpa [#allocation5], 0 }
   0xf   :  { %32 = vsyncpa [#allocation8], 0 }
  0x10   :  { %33 = vsyncpa [#allocation11], 0 }
  0x11   :  { %34 = vsyncpa [#allocation14], 0 }
  0x12   :  { %35 = vsyncpa [#allocation17], 0 }
  0x13   :  { %36 = vsyncpa [#allocation20], 0 }
  0x14   :  { %37 = vsyncpa [#allocation23], 0  ;;  %s3244_s6 = sld [smem:[#allocation35_spill]]  ;;  %s2254_s7 = smov [#allocation4]  }
  0x15   :  { %s59_s3 = sshll.u32 %s2254_s7, 4  ;;  %s3245_s8 = sld [smem:[#allocation37_spill]]  ;;  %s60_s3 = int_to_ptr.vmem [resolvable:$true] %s59_s3 }
  0x16   :  { %s2255_s4 = smov 128   ;;  %s2256_s28 = smov 8  }
  0x17   :  { %s2257_s9 = smov [#allocation7]   ;;  %s3246_s2 = sld [smem:[#allocation39_spill]] }
  0x18   :  { %s85_s5 = sshll.u32 %s2257_s9, 4  ;;  %s3247_s1 = sld [smem:[#allocation41_spill]]  ;;  %s86_s5 = int_to_ptr.vmem [resolvable:$true] %s85_s5 }
  0x19   :  { %s2258_s25 = smov [#allocation10]   ;;  %s161_s29 = sshll.u32 %s3215_s11, 4  ;;  %s162_s29 = int_to_ptr.hbm [resolvable:$true] %s161_s29 }
  0x1a   :  { %s57_s30 = sshll.u32 %s3244_s6, 4  ;;  %s111_s24 = sshll.u32 %s2258_s25, 4  ;;  %s58_s30 = int_to_ptr.hbm [resolvable:$true] %s57_s30  ;;  %s112_s24 = int_to_ptr.vmem [resolvable:$true] %s111_s24 }
  0x1b   :  { %s83_s27 = sshll.u32 %s3245_s8, 4  ;;  %s2262_s9 = smov [#allocation22]   ;;  %s84_s27 = int_to_ptr.hbm [resolvable:$true] %s83_s27 }
  0x1c   :  { %65 = dma.hbm_to_vmem [thread:$0]  %s58_s30, 512, %s60_s3, [#allocation5], %s2255_s4, %s2255_s4, %s2256_s28  }
  0x1d   :  { %s109_s6 = sshll.u32 %s3246_s2, 4  ;;  %s2259_s30 = smov [#allocation13]   ;;  %s110_s6 = int_to_ptr.hbm [resolvable:$true] %s109_s6 }
  0x1e   :  { %91 = dma.hbm_to_vmem [thread:$0]  %s84_s27, 512, %s86_s5, [#allocation8], %s2255_s4, %s2255_s4, %s2256_s28  }
  0x1f   :  { %s135_s8 = sshll.u32 %s3247_s1, 4  ;;  %s137_s3 = sshll.u32 %s2259_s30, 4  ;;  %s136_s8 = int_to_ptr.hbm [resolvable:$true] %s135_s8  ;;  %s138_s3 = int_to_ptr.vmem [resolvable:$true] %s137_s3 }
  0x20   :  { %117 = dma.hbm_to_vmem [thread:$0]  %s110_s6, 512, %s112_s24, [#allocation11], %s2255_s4, %s2255_s4, %s2256_s28  }
  0x21   :  { %143 = dma.hbm_to_vmem [thread:$0]  %s136_s8, 512, %s138_s3, [#allocation14], %s2255_s4, %s2255_s4, %s2256_s28  }
  0x22   :  { %s198_s5 = sshll.u32 %s3222_s18, 4  ;;  %s2260_s2 = smov [#allocation16]   ;;  %s199_s5 = int_to_ptr.hbm [resolvable:$true] %s198_s5 }
  0x23   :  { %s163_s7 = sshll.u32 %s2260_s2, 4  ;;  %s2261_s24 = smov [#allocation19]   ;;  %s164_s7 = int_to_ptr.vmem [resolvable:$true] %s163_s7 }
  0x24   :  { %169 = dma.hbm_to_vmem [thread:$0]  %s162_s29, 256, %s164_s7, [#allocation17], %s2255_s4, %s2255_s4, %s2256_s28  }
  0x25   :  { %s200_s11 = sshll.u32 %s2261_s24, 4  ;;  %s224_s1 = sshll.u32 %s3226_s22, 4  ;;  %s201_s11 = int_to_ptr.vmem [resolvable:$true] %s200_s11  ;;  %s225_s1 = int_to_ptr.hbm [resolvable:$true] %s224_s1 }
  0x26   :  { %203 = dma.hbm_to_vmem [thread:$0]  %s199_s5, 128, %s201_s11, [#allocation20]  }
  0x27   :  { %s3248_s18 = sld [smem:[#allocation33_spill]]  ;;  %s226_s0 = sshll.u32 %s2262_s9, 4  ;;  %s227_s0 = int_to_ptr.vmem [resolvable:$true] %s226_s0 }
  0x28   :  { %229 = dma.hbm_to_vmem [thread:$0]  %s225_s1, 128, %s227_s0, [#allocation23]  }
  0x29   :  { %s2263_s27 = smov [#allocation2]   ;;  %s3249_s7 = sld [smem:[#allocation36_spill]] }
  0x2a   :  { %s44_s29 = sshll.u32 %s2263_s27, 4  ;;  %s3250_s11 = sld [smem:[#allocation38_spill]]  ;;  %s45_s29 = int_to_ptr.vmem [resolvable:$true] %s44_s29 }
  0x2b   :  { %s2264_s26 = smov [#allocation6]   ;;  %s2265_s1 = smov [#allocation9]  }
  0x2c   :  { %s72_s8 = sshll.u32 %s2264_s26, 4  ;;  %s98_s30 = sshll.u32 %s2265_s1, 4  ;;  %s73_s8 = int_to_ptr.vmem [resolvable:$true] %s72_s8  ;;  %s99_s30 = int_to_ptr.vmem [resolvable:$true] %s98_s30 }
  0x2d   :  { %s42_s3 = sshll.u32 %s3248_s18, 4  ;;  %s3251_s0 = sld [smem:[#allocation40_spill]]  ;;  %s43_s3 = int_to_ptr.hbm [resolvable:$true] %s42_s3 }
  0x2e   :  { %50 = dma.hbm_to_vmem [thread:$0]  %s43_s3, 1024, %s45_s29, [#allocation3], %s2255_s4, %s2255_s4, %s2256_s28  }
  0x2f   :  { %s70_s24 = sshll.u32 %s3249_s7, 4  ;;  %s3252_s25 = sld [smem:[#allocation42_spill]]  ;;  %s71_s24 = int_to_ptr.hbm [resolvable:$true] %s70_s24 }
  0x30   :  { %s96_s6 = sshll.u32 %s3250_s11, 4  ;;  %s2266_s7 = smov [#allocation12]   ;;  %s97_s6 = int_to_ptr.hbm [resolvable:$true] %s96_s6 }
  0x31   :  { %78 = dma.hbm_to_vmem [thread:$0]  %s71_s24, 512, %s73_s8, [#allocation5], %s2255_s4, %s2255_s4, %s2256_s28  }
  0x32   :  { %104 = dma.hbm_to_vmem [thread:$0]  %s97_s6, 512, %s99_s30, [#allocation8], %s2255_s4, %s2255_s4, %s2256_s28  }
  0x33   :  { %s122_s27 = sshll.u32 %s3251_s0, 4  ;;  %s124_s22 = sshll.u32 %s2266_s7, 4  ;;  %s123_s27 = int_to_ptr.hbm [resolvable:$true] %s122_s27  ;;  %s125_s22 = int_to_ptr.vmem [resolvable:$true] %s124_s22 }
  0x34   :  { %130 = dma.hbm_to_vmem [thread:$0]  %s123_s27, 512, %s125_s22, [#allocation11], %s2255_s4, %s2255_s4, %s2256_s28  }
  0x35   :  { %s149_s2 = sshll.u32 %s3252_s25, 4  ;;  %s2267_s24 = smov [#allocation15]   ;;  %s150_s2 = int_to_ptr.hbm [resolvable:$true] %s149_s2 }
  0x36   :  { %s151_s5 = sshll.u32 %s2267_s24, 4  ;;  %s174_s8 = sshll.u32 %s3216_s12, 4  ;;  %s152_s5 = int_to_ptr.vmem [resolvable:$true] %s151_s5  ;;  %s175_s8 = int_to_ptr.hbm [resolvable:$true] %s174_s8 }
  0x37   :  { %154 = dma.hbm_to_vmem [thread:$0]  %s150_s2, 16, %s152_s5, [#allocation14]  }
  0x38   :  { %s213_s30 = sshll.u32 %s3225_s21, 4  ;;  %s2268_s18 = smov [#allocation18]   ;;  %s214_s30 = int_to_ptr.hbm [resolvable:$true] %s213_s30 }
  0x39   :  { %s176_s9 = sshll.u32 %s2268_s18, 4  ;;  %s2269_s0 = smov [#allocation21]   ;;  %s177_s9 = int_to_ptr.vmem [resolvable:$true] %s176_s9 }
  0x3a   :  { %182 = dma.hbm_to_vmem [thread:$0]  %s175_s8, 256, %s177_s9, [#allocation17], %s2255_s4, %s2255_s4, %s2256_s28  }
  0x3b   :  { %s215_s27 = sshll.u32 %s2269_s0, 4  ;;  %s234_s12 = sshll.u32 %s3227_s23, 4  ;;  %s216_s27 = int_to_ptr.vmem [resolvable:$true] %s215_s27  ;;  %s235_s12 = int_to_ptr.hbm [resolvable:$true] %s234_s12 }
  0x3c   :  { %218 = dma.hbm_to_vmem [thread:$0]  %s214_s30, 32, %s216_s27, [#allocation20]  }
  0x3d   :  { %s2270_s25 = smov [#allocation24]   ;;  %s2271_s21 = smov 512  }
  0x3e   :  { %s236_s2 = sshll.u32 %s2270_s25, 4  ;;  %s2272_s7 = smov 32   ;;  %s237_s2 = int_to_ptr.vmem [resolvable:$true] %s236_s2 }
  0x3f   :  { %242 = dma.hbm_to_vmem [thread:$0]  %s235_s12, 16384, %s237_s2, [#allocation23], %s2271_s21, %s2271_s21, %s2272_s7  }
  0x40   :  { %2238 = dma.done.wait [#allocation3], 1024  }
  0x41   :  { %2239 = vsyncadd [#allocation3], 4294966272 }
  0x42   :  { %2240 = dma.done.wait [#allocation5], 1024  }
  0x43   :  { %2241 = vsyncadd [#allocation5], 4294966272 }
  0x44   :  { %2242 = dma.done.wait [#allocation8], 1024  }
  0x45   :  { %2243 = vsyncadd [#allocation8], 4294966272 }
  0x46   :  { %2244 = dma.done.wait [#allocation11], 1024  }
  0x47   :  { %2245 = vsyncadd [#allocation11], 4294966272 }
  0x48   :  { %2246 = dma.done.wait [#allocation14], 528  }
  0x49   :  { %2247 = vsyncadd [#allocation14], 4294966768 }
  0x4a   :  { %2248 = dma.done.wait [#allocation17], 512  }
  0x4b   :  { %2249 = vsyncadd [#allocation17], 4294966784 }
  0x4c   :  { %2250 = dma.done.wait [#allocation20], 160  }
  0x4d   :  { %2251 = vsyncadd [#allocation20], 4294967136 }
  0x4e   :  { %2252 = dma.done.wait [#allocation23], 16512  }
  0x4f   :  { %2253 = vsyncadd [#allocation23], 4294950784  ;;  %v2478_v0 = vld [vmem:[#allocation2 + $0x38] sm:$0xff]  ;;  %v2480_v1 = vld [vmem:[#allocation2 + $0x30] sm:$0xff]  ;;  %s3253_s28 = sld [smem:[#allocation34_spill]]  ;;  %vm317_vm0 = vcmask 523264  }
  0x50   :  { %338 = vmatpush.msra.mxu0 %v2478_v0  ;;  %387 = vmatpush.msra.mxu1 %v2478_v0  ;;  %v310_v2 = vld [vmem:[#allocation2 + $0x28] sm:$0xff]  ;;  %v309_v3 = vld [vmem:[#allocation2 + $0x20] sm:$0xff]  ;;  %v308_v4 = vld [vmem:[#allocation2 + $0x18] sm:$0xff]  ;;  %vm412_vm1 = vcmask 261120   ;;  %vm700_vm2 = vcmask 1045504   ;;  %vm693_vm3 = vcmask 244736  }
  0x51   :  { %v307_v5 = vld [vmem:[#allocation2 + $0x10] sm:$0xff]  ;;  %v411_v6 = vld [vmem:[#allocation10 + $0x18] sm:$0xff]  ;;  %v306_v10 = vld [vmem:[#allocation2 + $0x8] sm:$0xff]  ;;  %vm818_vm4 = vcmask 982016   ;;  %vm1051_vm5 = vcmask 113664   ;;  %vm1257_vm6 = vcmask 785408  }
  0x52   :  { %339 = vmatpush.msra.mxu0 %v2480_v1  ;;  %388 = vmatpush.msra.mxu1 %v2480_v1  ;;  %v362_v7 = vld [vmem:[#allocation9 + $0x18] sm:$0xff]  ;;  %v410_v8 = vld [vmem:[#allocation10 + $0x10] sm:$0xff]  ;;  %v409_v11 = vld [vmem:[#allocation10 + $0x8] sm:$0xff]  ;;  %vm1433_vm7 = vcmask 64512   ;;  %s3254_s12 = sld [smem:[#allocation43_spill]] }
  0x53   :  { %v361_v9 = vld [vmem:[#allocation9 + $0x10] sm:$0xff]  ;;  %437 = vmatpush.msra.mxu2 %v411_v6  ;;  %478 = vmatpush.msra.mxu3 %v362_v7  ;;  %v360_v12 = vld [vmem:[#allocation9 + $0x8] sm:$0xff]  ;;  %v305_v13 = vld [vmem:[#allocation2] sm:$0xff] }
  0x54   :  { %340 = vmatpush.msra.mxu0 %v310_v2  ;;  %389 = vmatpush.msra.mxu1 %v310_v2  ;;  %v363_v15 = vld [vmem:[#allocation4] sm:$0xff]  ;;  %v364_v17 = vld [vmem:[#allocation4 + $0x8] sm:$0xff]  ;;  %v365_v19 = vld [vmem:[#allocation4 + $0x10] sm:$0xff] }
  0x55   :  { %438 = vmatpush.msra.mxu2 %v410_v8  ;;  %479 = vmatpush.msra.mxu3 %v361_v9  ;;  %v313_v14 = vld [vmem:[%s3253_s28] sm:$0xff]  ;;  %v314_v16 = vld [vmem:[%s3253_s28 + $0x8] sm:$0xff]  ;;  %v315_v18 = vld [vmem:[%s3253_s28 + $0x10] sm:$0xff] }
  0x56   :  { %341 = vmatpush.msra.mxu0 %v309_v3  ;;  %390 = vmatpush.msra.mxu1 %v309_v3  ;;  %v316_v20 = vld [vmem:[%s3253_s28 + $0x18] sm:$0x3f]  ;;  %v408_v22 = vld [vmem:[#allocation10] sm:$0xff]  ;;  %v590_v31 = vld [vmem:[#allocation7 + $0x8] sm:$0xff] }
  0x57   :  { %439 = vmatpush.msra.mxu2 %v409_v11  ;;  %480 = vmatpush.msra.mxu3 %v360_v12  ;;  %v366_v21 = vld [vmem:[#allocation4 + $0x18] sm:$0x3f]  ;;  %v359_v23 = vld [vmem:[#allocation9] sm:$0xff]  ;;  %v591_v34 = vld [vmem:[#allocation7 + $0x10] sm:$0xff] }
  0x58   :  { %342 = vmatpush.msra.mxu0 %v308_v4  ;;  %391 = vmatpush.msra.mxu1 %v308_v4  ;;  %v589_v28 = vld [vmem:[#allocation7] sm:$0xff]  ;;  %v592_v36 = vld [vmem:[#allocation7 + $0x18] sm:$0x3f]  ;;  %v496_v37 = vld [vmem:[#allocation6 + $0x8] sm:$0xff] }
  0x59   :  { %440 = vmatpush.msra.mxu2 %v408_v22  ;;  %481 = vmatpush.msra.mxu3 %v359_v23  ;;  %v495_v35 = vld [vmem:[#allocation6] sm:$0xff]  ;;  %v497_v38 = vld [vmem:[#allocation6 + $0x10] sm:$0xff]  ;;  %v498_v39 = vld [vmem:[#allocation6 + $0x18] sm:$0x3f] }
  0x5a   :  { %343 = vmatpush.msra.mxu0 %v307_v5  ;;  %392 = vmatpush.msra.mxu1 %v307_v5  ;;  %v543_v40 = vld [vmem:[#allocation12 + $0x18] sm:$0xff]  ;;  %v542_v41 = vld [vmem:[#allocation12 + $0x10] sm:$0xff]  ;;  %v541_v42 = vld [vmem:[#allocation12 + $0x8] sm:$0xff] }
  0x5b   :  { %519 = vmatpush.msrb.mxu2 %v2478_v0  ;;  %568 = vmatpush.msrb.mxu3 %v543_v40  ;;  %v540_v43 = vld [vmem:[#allocation12] sm:$0xff]  ;;  %v637_v45 = vld [vmem:[#allocation13 + $0x18] sm:$0xff]  ;;  %v636_v46 = vld [vmem:[#allocation13 + $0x10] sm:$0xff] }
  0x5c   :  { %344 = vmatpush.msra.mxu0 %v306_v10  ;;  %393 = vmatpush.msra.mxu1 %v306_v10  ;;  %v635_v47 = vld [vmem:[#allocation13 + $0x8] sm:$0xff]  ;;  %v634_v48 = vld [vmem:[#allocation13] sm:$0xff]  ;;  %v814_v62 = vld [vmem:[%s3218_s14 + $0xd0] sm:$0xff] }
  0x5d   :  { %520 = vmatpush.msrb.mxu2 %v2480_v1  ;;  %569 = vmatpush.msrb.mxu3 %v542_v41  ;;  %v816_v61 = vld [vmem:[%s3218_s14 + $0xe0] sm:$0xff]  ;;  %v802_v6 = vld [vmem:[%s3218_s14 + $0x70] sm:$0xff]  ;;  %v815_v22 = vld [vmem:[%s3218_s14 + $0xd8] sm:$0xff] }
  0x5e   :  { %345 = vmatpush.msra.mxu0 %v305_v13  ;;  %394 = vmatpush.msra.mxu1 %v305_v13  ;;  %v800_v7 = vld [vmem:[%s3218_s14 + $0x60] sm:$0xff]  ;;  %v798_v8 = vld [vmem:[%s3218_s14 + $0x50] sm:$0xff]  ;;  %v813_v23 = vld [vmem:[%s3218_s14 + $0xc8] sm:$0xff] }
  0x5f   :  { %1791 = vmatmul.msk.f32.vlgmr.msra.gmra.mxu0 %vm317_vm0, %v313_v14  ;;  %1795 = vmatmul.msk.f32.vlgmr.msra.gmra.mxu1 %vm317_vm0, %v363_v15  ;;  %v796_v9 = vld [vmem:[%s3218_s14 + $0x40] sm:$0xff]  ;;  %v790_v14 = vld [vmem:[%s3218_s14 + $0x10] sm:$0xff]  ;;  %v805_v40 = vld [vmem:[%s3218_s14 + $0x88] sm:$0xff] }
  0x60   :  { %613 = vmatpush.msrb.mxu0 %v2478_v0  ;;  %521 = vmatpush.msrb.mxu2 %v310_v2  ;;  %v812_v0 = vld [vmem:[%s3218_s14 + $0xc0] sm:$0xff] }
  0x61   :  { %570 = vmatpush.msrb.mxu3 %v541_v42  ;;  %662 = vmatpush.msrb.mxu1 %v637_v45  ;;  %v792_v12 = vld [vmem:[%s3218_s14 + $0x20] sm:$0xff] }
  0x62   :  { %614 = vmatpush.msrb.mxu0 %v2480_v1  ;;  %522 = vmatpush.msrb.mxu2 %v309_v3  ;;  %v810_v1 = vld [vmem:[%s3218_s14 + $0xb0] sm:$0xff]  ;;  %v788_v15 = vld [vmem:[%s3218_s14] sm:$0xff] }
  0x63   :  { %571 = vmatpush.msrb.mxu3 %v540_v43  ;;  %663 = vmatpush.msrb.mxu1 %v636_v46  ;;  %v803_v43 = vld [vmem:[%s3218_s14 + $0x78] sm:$0xff] }
  0x64   :  { %615 = vmatpush.msrb.mxu0 %v310_v2  ;;  %523 = vmatpush.msrb.mxu2 %v308_v4  ;;  %v808_v2 = vld [vmem:[%s3218_s14 + $0xa0] sm:$0xff] }
  0x65   :  { %664 = vmatpush.msrb.mxu1 %v635_v47 }
  0x66   :  { %616 = vmatpush.msrb.mxu0 %v309_v3  ;;  %524 = vmatpush.msrb.mxu2 %v307_v5  ;;  %v806_v3 = vld [vmem:[%s3218_s14 + $0x90] sm:$0xff] }
  0x67   :  { %1792 = vmatmul.msk.f32.gmra.mxu0 %vm317_vm0, %v314_v16  ;;  %1796 = vmatmul.msk.f32.gmra.mxu1 %vm317_vm0, %v364_v17 }
  0x68   :  { %617 = vmatpush.msrb.mxu0 %v308_v4  ;;  %525 = vmatpush.msrb.mxu2 %v306_v10  ;;  %v804_v4 = vld [vmem:[%s3218_s14 + $0x80] sm:$0xff] }
  0x69   :  { %665 = vmatpush.msrb.mxu1 %v634_v48  ;;  %v757_v48 = vld [vmem:[#allocation16] sm:$0xff] }
  0x6a   :  { %618 = vmatpush.msrb.mxu0 %v307_v5  ;;  %526 = vmatpush.msrb.mxu2 %v305_v13 }
  0x6c   :  { %619 = vmatpush.msrb.mxu0 %v306_v10  ;;  %v794_v10 = vld [vmem:[%s3218_s14 + $0x30] sm:$0xff] }
  0x6e   :  { %620 = vmatpush.msrb.mxu0 %v305_v13 }
  0x6f   :  { %1793 = vmatmul.msk.f32.gmra.mxu0 %vm317_vm0, %v315_v18  ;;  %1797 = vmatmul.msk.f32.gmra.mxu1 %vm317_vm0, %v365_v19 }
  0x70   :  { %826 = vmatpush.msra.mxu0 %v816_v61  ;;  %v747_v61 = vld [vmem:[%s3217_s13 + $0xa0] sm:$0xff] }
  0x72   :  { %827 = vmatpush.msra.mxu0 %v814_v62  ;;  %v746_v62 = vld [vmem:[%s3217_s13 + $0x98] sm:$0xff] }
  0x74   :  { %828 = vmatpush.msra.mxu0 %v812_v0  ;;  %v744_v0 = vld [vmem:[%s3217_s13 + $0x88] sm:$0xff] }
  0x76   :  { %829 = vmatpush.msra.mxu0 %v810_v1  ;;  %v743_v1 = vld [vmem:[%s3217_s13 + $0x80] sm:$0xff] }
  0x77   :  { %1794 = vmatmul.msk.f32.gmra.mxu0 %vm317_vm0, %v316_v20  ;;  %1798 = vmatmul.msk.f32.gmra.mxu1 %vm317_vm0, %v366_v21  ;;  %v817_v21 = vld [vmem:[%s3218_s14 + $0xe8] sm:$0xff] }
  0x78   :  { %830 = vmatpush.msra.mxu0 %v808_v2  ;;  %849 = vmatpush.msra.mxu1 %v817_v21  ;;  %v742_v2 = vld [vmem:[%s3217_s13 + $0x78] sm:$0xff] }
  0x79   :  { %v791_v21 = vld [vmem:[%s3218_s14 + $0x18] sm:$0xff] }
  0x7a   :  { %831 = vmatpush.msra.mxu0 %v806_v3  ;;  %850 = vmatpush.msra.mxu1 %v815_v22  ;;  %v741_v3 = vld [vmem:[%s3217_s13 + $0x70] sm:$0xff]  ;;  %v727_v22 = vld [vmem:[%s3217_s13] sm:$0xff] }
  0x7c   :  { %832 = vmatpush.msra.mxu0 %v804_v4  ;;  %851 = vmatpush.msra.mxu1 %v813_v23  ;;  %v740_v4 = vld [vmem:[%s3217_s13 + $0x68] sm:$0xff] }
  0x7d   :  { %v728_v23 = vld [vmem:[%s3217_s13 + $0x8] sm:$0xff] }
  0x7e   :  { %833 = vmatpush.msra.mxu0 %v802_v6  ;;  %v738_v6 = vld [vmem:[%s3217_s13 + $0x58] sm:$0xff] }
  0x7f   :  { %1815 = vmatmul.msk.f32.vlgmr.msrb.gmra.mxu0 %vm317_vm0, %v589_v28 }
  0x80   :  { %834 = vmatpush.msra.mxu0 %v800_v7  ;;  %v737_v7 = vld [vmem:[%s3217_s13 + $0x50] sm:$0xff] }
  0x82   :  { %835 = vmatpush.msra.mxu0 %v798_v8  ;;  %v736_v8 = vld [vmem:[%s3217_s13 + $0x48] sm:$0xff] }
  0x84   :  { %836 = vmatpush.msra.mxu0 %v796_v9  ;;  %v735_v9 = vld [vmem:[%s3217_s13 + $0x40] sm:$0xff] }
  0x86   :  { %837 = vmatpush.msra.mxu0 %v794_v10  ;;  %v801_v10 = vld [vmem:[%s3218_s14 + $0x68] sm:$0xff] }
  0x87   :  { %1816 = vmatmul.msk.f32.gmra.mxu0 %vm317_vm0, %v590_v31 }
  0x88   :  { %838 = vmatpush.msra.mxu0 %v792_v12  ;;  %v797_v12 = vld [vmem:[%s3218_s14 + $0x48] sm:$0xff] }
  0x8a   :  { %839 = vmatpush.msra.mxu0 %v790_v14  ;;  %v734_v14 = vld [vmem:[%s3217_s13 + $0x38] sm:$0xff] }
  0x8c   :  { %840 = vmatpush.msra.mxu0 %v788_v15  ;;  %v795_v15 = vld [vmem:[%s3218_s14 + $0x38] sm:$0xff] }
  0x8f   :  { %1817 = vmatmul.msk.f32.gmra.mxu0 %vm317_vm0, %v591_v34 }
  0x97   :  { %1818 = vmatmul.msk.f32.gmra.mxu0 %vm317_vm0, %v592_v36 }
  0xdc   :  { %v347_v24 = vpop.f32.mrf.mxu0  ;;  %v396_v25 = vpop.f32.mrf.mxu1 }
  0xdd   :  { %1799 = vmatmul.msk.f32.vlgmr.msra.gmra.mxu2 %vm412_vm1, %v396_v25  ;;  %1803 = vmatmul.msk.f32.vlgmr.msra.gmra.mxu3 %vm412_vm1, %v347_v24  ;;  %v811_v25 = vld [vmem:[%s3218_s14 + $0xb8] sm:$0xff] }
  0xde   :  { %852 = vmatpush.msra.mxu1 %v811_v25  ;;  %v982_v25 = vld [vmem:[%s3219_s15 + $0xe0] sm:$0xff] }
  0xe4   :  { %v350_v26 = vpop.f32.mrf.mxu0  ;;  %v399_v27 = vpop.f32.mrf.mxu1 }
  0xe5   :  { %1800 = vmatmul.msk.f32.gmra.mxu2 %vm412_vm1, %v399_v27  ;;  %1804 = vmatmul.msk.f32.gmra.mxu3 %vm412_vm1, %v350_v26 }
  0xec   :  { %v353_v29 = vpop.f32.mrf.mxu0  ;;  %v402_v30 = vpop.f32.mrf.mxu1 }
  0xed   :  { %1801 = vmatmul.msk.f32.gmra.mxu2 %vm412_vm1, %v402_v30  ;;  %1805 = vmatmul.msk.f32.gmra.mxu3 %vm412_vm1, %v353_v29  ;;  %v809_v29 = vld [vmem:[%s3218_s14 + $0xa8] sm:$0xff] }
  0xee   :  { %853 = vmatpush.msra.mxu1 %v809_v29 }
  0xf4   :  { %v356_v32 = vpop.f32.mrf.mxu0  ;;  %v405_v33 = vpop.f32.mrf.mxu1 }
  0xf5   :  { %1802 = vmatmul.msk.f32.gmra.mxu2 %vm412_vm1, %v405_v33  ;;  %1806 = vmatmul.msk.f32.gmra.mxu3 %vm412_vm1, %v356_v32 }
  0xfc   :  { %v622_v50 = vpop.f32.mrf.mxu0 }
  0xfd   :  { %1807 = vmatmul.msk.f32.vlgmr.msrb.gmra.mxu2 %vm317_vm0, %v495_v35  ;;  %1819 = vmatmul.msk.f32.vlgmr.msrb.gmra.mxu1 %vm412_vm1, %v622_v50  ;;  %v807_v35 = vld [vmem:[%s3218_s14 + $0x98] sm:$0xff]  ;;  %v756_v50 = vld [vmem:[%s3217_s13 + $0xe8] sm:$0xff] }
  0xfe   :  { %854 = vmatpush.msra.mxu1 %v807_v35  ;;  %v979_v35 = vld [vmem:[%s3219_s15 + $0xc8] sm:$0xff] }
 0x100   :  { %855 = vmatpush.msra.mxu1 %v805_v40  ;;  %v973_v40 = vld [vmem:[%s3219_s15 + $0x98] sm:$0xff] }
 0x102   :  { %856 = vmatpush.msra.mxu1 %v803_v43  ;;  %v970_v43 = vld [vmem:[%s3219_s15 + $0x80] sm:$0xff] }
 0x104   :  { %v625_v52 = vpop.f32.mrf.mxu0  ;;  %857 = vmatpush.msra.mxu1 %v801_v10  ;;  %v1249_v10 = vld [vmem:[%s3224_s20 + $0x180] sm:$0xff] }
 0x105   :  { %1808 = vmatmul.msk.f32.gmra.mxu2 %vm317_vm0, %v496_v37  ;;  %1820 = vmatmul.msk.f32.gmra.mxu1 %vm412_vm1, %v625_v52  ;;  %v1877_v37 = vld [vmem:[#allocation15] ss:$0 sm:$0xff]  ;;  %v754_v52 = vld [vmem:[%s3217_s13 + $0xd8] sm:$0xff] }
 0x10c   :  { %v628_v54 = vpop.f32.mrf.mxu0 }
 0x10d   :  { %1809 = vmatmul.msk.f32.gmra.mxu2 %vm317_vm0, %v497_v38  ;;  %1821 = vmatmul.msk.f32.gmra.mxu1 %vm412_vm1, %v628_v54  ;;  %v752_v54 = vld [vmem:[%s3217_s13 + $0xc8] sm:$0xff] }
 0x114   :  { %v631_v56 = vpop.f32.mrf.mxu0 }
 0x115   :  { %1810 = vmatmul.msk.f32.gmra.mxu2 %vm317_vm0, %v498_v39  ;;  %1822 = vmatmul.msk.f32.gmra.mxu1 %vm412_vm1, %v631_v56  ;;  %v750_v56 = vld [vmem:[%s3217_s13 + $0xb8] sm:$0xff] }
 0x160   :  { %v2526_v44 = vpop.f32.mrf.mxu2  ;;  %v483_v60 = vpop.f32.mrf.mxu3 }
 0x161   :  { %v484_v32 = vadd.f32 %v483_v60, %v2526_v44  ;;  %v748_v60 = vld [vmem:[%s3217_s13 + $0xa8] sm:$0xff] }
 0x168   :  { %v2528_v49 = vpop.f32.mrf.mxu2  ;;  %v486_v63 = vpop.f32.mrf.mxu3 }
 0x169   :  { %v487_v26 = vadd.f32 %v486_v63, %v2528_v49  ;;  %v691_v49 = vld [vmem:[%s3214_s10] sm:$0xff]  ;;  %v745_v63 = vld [vmem:[%s3217_s13 + $0x90] sm:$0xff] }
 0x170   :  { %v448_v51 = vpop.f32.mrf.mxu2  ;;  %v489_v5 = vpop.f32.mrf.mxu3 }
 0x171   :  { %v490_v24 = vadd.f32 %v489_v5, %v448_v51  ;;  %v755_v51 = vld [vmem:[%s3217_s13 + $0xe0] sm:$0xff] }
 0x172   :  { %v739_v5 = vld [vmem:[%s3217_s13 + $0x60] sm:$0xff] }
 0x178   :  { %v451_v53 = vpop.f32.mrf.mxu2  ;;  %v492_v11 = vpop.f32.mrf.mxu3 }
 0x179   :  { %v493_v27 = vadd.f32 %v492_v11, %v451_v53  ;;  %v753_v53 = vld [vmem:[%s3217_s13 + $0xd0] sm:$0xff]  ;;  %v799_v11 = vld [vmem:[%s3218_s14 + $0x58] sm:$0xff] }
 0x17a   :  { %v667_v13 = vpop.f32.mrf.mxu1  ;;  %858 = vmatpush.msra.mxu1 %v799_v11  ;;  %v1247_v11 = vld [vmem:[%s3224_s20 + $0x170] sm:$0xff] }
 0x17c   :  { %859 = vmatpush.msra.mxu1 %v797_v12 }
 0x17e   :  { %860 = vmatpush.msra.mxu1 %v795_v15  ;;  %v1040_v15 = vld [vmem:[%s3220_s16] sm:$0x3] }
 0x180   :  { %v528_v55 = vpop.f32.mrf.mxu2 }
 0x181   :  { %1811 = vmatmul.msk.f32.vlgmr.msrb.gmra.mxu3 %vm412_vm1, %v528_v55  ;;  %v751_v55 = vld [vmem:[%s3217_s13 + $0xc0] sm:$0xff] }
 0x182   :  { %v670_v17 = vpop.f32.mrf.mxu1 }
 0x188   :  { %v531_v57 = vpop.f32.mrf.mxu2 }
 0x189   :  { %1812 = vmatmul.msk.f32.gmra.mxu3 %vm412_vm1, %v531_v57  ;;  %v758_v57 = vld [vmem:[#allocation16 + $0x8] sm:$0x3f] }
 0x18a   :  { %v673_v19 = vpop.f32.mrf.mxu1 }
 0x190   :  { %v534_v58 = vpop.f32.mrf.mxu2 }
 0x191   :  { %1813 = vmatmul.msk.f32.gmra.mxu3 %vm412_vm1, %v534_v58  ;;  %v749_v58 = vld [vmem:[%s3217_s13 + $0xb0] sm:$0xff] }
 0x192   :  { %v676_v31 = vpop.f32.mrf.mxu1 }
 0x198   :  { %v537_v59 = vpop.f32.mrf.mxu2 }
 0x199   :  { %1814 = vmatmul.msk.f32.gmra.mxu3 %vm412_vm1, %v537_v59  ;;  %v692_v59 = vld [vmem:[%s3214_s10 + $0x8] sm:$0x3f] }
 0x204   :  { %v573_v16 = vpop.f32.mrf.mxu3 }
 0x205   :  { %v585_v36 = vadd.f32 %v573_v16, %v484_v32  ;;  %v731_v16 = vld [vmem:[%s3217_s13 + $0x20] sm:$0xff] }
 0x207   :  { %v679_v44 = vadd.f32 %v667_v13, %v585_v36  ;;  %v733_v13 = vld [vmem:[%s3217_s13 + $0x30] sm:$0xff] }
 0x209   :  { %v687_v47 = vadd.f32 %v1877_v37, %v679_v44  ;;  %v971_v44 = vld [vmem:[%s3219_s15 + $0x88] sm:$0xff] }
 0x20c   :  { %v576_v18 = vpop.f32.mrf.mxu3 }
 0x20d   :  { %v586_v33 = vadd.f32 %v576_v18, %v487_v26  ;;  %v793_v18 = vld [vmem:[%s3218_s14 + $0x28] sm:$0xff]  ;;  %v980_v26 = vld [vmem:[%s3219_s15 + $0xd0] sm:$0xff] }
 0x20e   :  { %861 = vmatpush.msra.mxu1 %v793_v18 }
 0x20f   :  { %v680_v41 = vadd.f32 %v670_v17, %v586_v33  ;;  %v732_v17 = vld [vmem:[%s3217_s13 + $0x28] sm:$0xff]  ;;  %v981_v33 = vld [vmem:[%s3219_s15 + $0xd8] sm:$0xff] }
 0x210   :  { %862 = vmatpush.msra.mxu1 %v791_v21  ;;  %v1042_v21 = vperm.slane %v1040_v15, 0 }
 0x211   :  { %v688_v46 = vadd.f32 %v1877_v37, %v680_v41  ;;  %v923_v41 = vld [vmem:[#allocation18] sm:$0xff] }
 0x214   :  { %v579_v20 = vpop.f32.mrf.mxu3 }
 0x215   :  { %v587_v28 = vadd.f32 %v579_v20, %v490_v24  ;;  %v730_v20 = vld [vmem:[%s3217_s13 + $0x18] sm:$0xff]  ;;  %v789_v24 = vld [vmem:[%s3218_s14 + $0x8] sm:$0xff] }
 0x216   :  { %863 = vmatpush.msra.mxu1 %v789_v24 }
 0x217   :  { %v681_v38 = vadd.f32 %v673_v19, %v587_v28  ;;  %v729_v19 = vld [vmem:[%s3217_s13 + $0x10] sm:$0xff]  ;;  %s3255_s13 = sld [smem:[#allocation44_spill]] }
 0x218   :  { %991 = vmatpush.msrb.mxu1 %v982_v25  ;;  %v976_v28 = vld [vmem:[%s3219_s15 + $0xb0] sm:$0xff]  ;;  %v1241_v25 = vld [vmem:[%s3224_s20 + $0x140] sm:$0xff] }
 0x219   :  { %v689_v45 = vadd.f32 %v1877_v37, %v681_v38 }
 0x21a   :  { %992 = vmatpush.msrb.mxu1 %v980_v26 }
 0x21c   :  { %v582_v30 = vpop.f32.mrf.mxu3 }
 0x21d   :  { %v588_v34 = vadd.f32 %v582_v30, %v493_v27  ;;  %v978_v27 = vld [vmem:[%s3219_s15 + $0xc0] sm:$0xff]  ;;  %v983_v30 = vld [vmem:[%s3219_s15 + $0xe8] sm:$0xff] }
 0x21e   :  { %993 = vmatpush.msrb.mxu1 %v978_v27 }
 0x21f   :  { %v682_v39 = vadd.f32 %v676_v31, %v588_v34  ;;  %v974_v31 = vld [vmem:[%s3219_s15 + $0xa0] sm:$0xff]  ;;  %v972_v34 = vld [vmem:[%s3219_s15 + $0x90] sm:$0xff] }
 0x220   :  { %994 = vmatpush.msrb.mxu1 %v976_v28 }
 0x221   :  { %v690_v42 = vadd.f32 %v1877_v37, %v682_v39  ;;  %v977_v37 = vld [vmem:[%s3219_s15 + $0xb8] sm:$0xff]  ;;  %v975_v39 = vld [vmem:[%s3219_s15 + $0xa8] sm:$0xff] }
 0x222   :  { %995 = vmatpush.msrb.mxu1 %v974_v31 }
 0x223   :  { %1823 = vmatpush.msk.msra.mxu2 %vm700_vm2, %v690_v42  ;;  %1826 = vmatpush.msk.msra.mxu3 %vm700_vm2, %v690_v42 }
 0x224   :  { %1837 = vmatpush.msk.msrb.mxu0 %vm700_vm2, %v690_v42  ;;  %996 = vmatpush.msrb.mxu1 %v972_v34  ;;  %v924_v42 = vld [vmem:[#allocation18 + $0x8] sm:$0x3f] }
 0x225   :  { %717 = vmatpush.msra.mxu2 %v689_v45  ;;  %778 = vmatpush.msra.mxu3 %v689_v45 }
 0x226   :  { %944 = vmatpush.msrb.mxu0 %v689_v45  ;;  %v968_v45 = vld [vmem:[%s3219_s15 + $0x70] sm:$0xff]  ;;  %997 = vmatpush.msrb.mxu1 %v970_v43 }
 0x227   :  { %718 = vmatpush.msra.mxu2 %v688_v46  ;;  %779 = vmatpush.msra.mxu3 %v688_v46  ;;  %v1235_v43 = vld [vmem:[%s3224_s20 + $0x110] sm:$0xff] }
 0x228   :  { %945 = vmatpush.msrb.mxu0 %v688_v46  ;;  %v969_v46 = vld [vmem:[%s3219_s15 + $0x78] sm:$0xff]  ;;  %998 = vmatpush.msrb.mxu1 %v968_v45  ;;  %v1254_v45 = vld [vmem:[%s3224_s20 + $0x1a8] sm:$0xff] }
 0x229   :  { %719 = vmatpush.msra.mxu2 %v687_v47  ;;  %780 = vmatpush.msra.mxu3 %v687_v47 }
 0x22a   :  { %946 = vmatpush.msrb.mxu0 %v687_v47  ;;  %1827 = vmatmul.msk.f32.vlgmr.msra.gmra.mxu3 %vm693_vm3, %v757_v48  ;;  %v966_v47 = vld [vmem:[%s3219_s15 + $0x60] sm:$0xff]  ;;  %v967_v48 = vld [vmem:[%s3219_s15 + $0x68] sm:$0xff] }
 0x22b   :  { %1824 = vmatmul.msk.f32.vlgmr.msra.gmra.mxu2 %vm693_vm3, %v691_v49  ;;  %901 = vmatpush.msrb.mxu3 %v756_v50  ;;  %v964_v49 = vld [vmem:[%s3219_s15 + $0x50] sm:$0xff]  ;;  %v965_v50 = vld [vmem:[%s3219_s15 + $0x58] sm:$0xff] }
 0x22c   :  { %878 = vmatpush.msrb.mxu2 %v755_v51  ;;  %999 = vmatpush.msrb.mxu1 %v966_v47  ;;  %v962_v51 = vld [vmem:[%s3219_s15 + $0x40] sm:$0xff] }
 0x22d   :  { %902 = vmatpush.msrb.mxu3 %v754_v52  ;;  %v963_v52 = vld [vmem:[%s3219_s15 + $0x48] sm:$0xff]  ;;  %v1233_v47 = vld [vmem:[%s3224_s20 + $0x100] sm:$0xff] }
 0x22e   :  { %879 = vmatpush.msrb.mxu2 %v753_v53  ;;  %1000 = vmatpush.msrb.mxu1 %v964_v49  ;;  %v960_v53 = vld [vmem:[%s3219_s15 + $0x30] sm:$0xff]  ;;  %v1252_v49 = vld [vmem:[%s3224_s20 + $0x198] sm:$0xff] }
 0x22f   :  { %903 = vmatpush.msrb.mxu3 %v752_v54  ;;  %v961_v54 = vld [vmem:[%s3219_s15 + $0x38] sm:$0xff] }
 0x230   :  { %880 = vmatpush.msrb.mxu2 %v751_v55  ;;  %1001 = vmatpush.msrb.mxu1 %v962_v51  ;;  %v958_v55 = vld [vmem:[%s3219_s15 + $0x20] sm:$0xff]  ;;  %v1223_v51 = vld [vmem:[%s3224_s20 + $0xb0] sm:$0xff] }
 0x231   :  { %904 = vmatpush.msrb.mxu3 %v750_v56  ;;  %v959_v56 = vld [vmem:[%s3219_s15 + $0x28] sm:$0xff] }
 0x232   :  { %1828 = vmatmul.msk.f32.gmra.mxu3 %vm693_vm3, %v758_v57  ;;  %881 = vmatpush.msrb.mxu2 %v749_v58  ;;  %v956_v57 = vld [vmem:[%s3219_s15 + $0x10] sm:$0xff]  ;;  %v957_v58 = vld [vmem:[%s3219_s15 + $0x18] sm:$0xff] }
 0x233   :  { %1825 = vmatmul.msk.f32.gmra.mxu2 %vm693_vm3, %v692_v59  ;;  %905 = vmatpush.msrb.mxu3 %v748_v60  ;;  %v954_v59 = vld [vmem:[%s3219_s15] sm:$0xff]  ;;  %v955_v60 = vld [vmem:[%s3219_s15 + $0x8] sm:$0xff] }
 0x234   :  { %882 = vmatpush.msrb.mxu2 %v747_v61  ;;  %1002 = vmatpush.msrb.mxu1 %v960_v53  ;;  %v1250_v53 = vld [vmem:[%s3224_s20 + $0x188] sm:$0xff] }
 0x235   :  { %906 = vmatpush.msrb.mxu3 %v746_v62 }
 0x236   :  { %883 = vmatpush.msrb.mxu2 %v745_v63  ;;  %1003 = vmatpush.msrb.mxu1 %v958_v55  ;;  %v1221_v55 = vld [vmem:[%s3224_s20 + $0xa0] sm:$0xff] }
 0x237   :  { %907 = vmatpush.msrb.mxu3 %v744_v0 }
 0x238   :  { %884 = vmatpush.msrb.mxu2 %v743_v1  ;;  %1004 = vmatpush.msrb.mxu1 %v956_v57  ;;  %v1248_v57 = vld [vmem:[%s3224_s20 + $0x178] sm:$0xff] }
 0x239   :  { %908 = vmatpush.msrb.mxu3 %v742_v2 }
 0x23a   :  { %885 = vmatpush.msrb.mxu2 %v741_v3  ;;  %1005 = vmatpush.msrb.mxu1 %v954_v59  ;;  %v1219_v59 = vld [vmem:[%s3224_s20 + $0x90] sm:$0xff] }
 0x23b   :  { %909 = vmatpush.msrb.mxu3 %v740_v4 }
 0x23c   :  { %886 = vmatpush.msrb.mxu2 %v739_v5  ;;  %v1255_v5 = vld [vmem:[%s3224_s20 + $0x1b0] sm:$0xff] }
 0x23d   :  { %910 = vmatpush.msrb.mxu3 %v738_v6  ;;  %v1253_v6 = vld [vmem:[%s3224_s20 + $0x1a0] sm:$0xff] }
 0x23e   :  { %887 = vmatpush.msrb.mxu2 %v737_v7  ;;  %v1251_v7 = vld [vmem:[%s3224_s20 + $0x190] sm:$0xff] }
 0x23f   :  { %911 = vmatpush.msrb.mxu3 %v736_v8 }
 0x240   :  { %888 = vmatpush.msrb.mxu2 %v735_v9 }
 0x241   :  { %912 = vmatpush.msrb.mxu3 %v734_v14  ;;  %v1245_v14 = vld [vmem:[%s3224_s20 + $0x160] sm:$0xff] }
 0x242   :  { %889 = vmatpush.msrb.mxu2 %v733_v13 }
 0x243   :  { %913 = vmatpush.msrb.mxu3 %v732_v17 }
 0x244   :  { %890 = vmatpush.msrb.mxu2 %v731_v16  ;;  %v1243_v16 = vld [vmem:[%s3224_s20 + $0x150] sm:$0xff] }
 0x245   :  { %914 = vmatpush.msrb.mxu3 %v730_v20 }
 0x246   :  { %891 = vmatpush.msrb.mxu2 %v729_v19 }
 0x247   :  { %915 = vmatpush.msrb.mxu3 %v728_v23 }
 0x248   :  { %892 = vmatpush.msrb.mxu2 %v727_v22  ;;  %v1043_v22 = vperm.slane %v1040_v15, 1  ;;  %v1236_v15 = vld [vmem:[%s3224_s20 + $0x118] sm:$0xff] }
 0x2ad   :  { %v782_v29 = vpop.f32.mrf.mxu3 }
 0x2ae   :  { %1829 = vmatmul.msk.f32.vlgmr.msra.gmra.mxu0 %vm818_vm4, %v782_v29  ;;  %v721_v32 = vpop.f32.mrf.mxu2  ;;  %1831 = vmatmul.msk.f32.vlgmr.msra.gmra.mxu1 %vm818_vm4, %v782_v29 }
 0x2af   :  { %1833 = vmatmul.msk.f32.vlgmr.msrb.gmra.mxu2 %vm818_vm4, %v721_v32  ;;  %1835 = vmatmul.msk.f32.vlgmr.msrb.gmra.mxu3 %vm818_vm4, %v721_v32 }
 0x2b0   :  { %1014 = vmatpush.msra.mxu0 %v983_v30  ;;  %v1239_v30 = vld [vmem:[%s3224_s20 + $0x130] sm:$0xff] }
 0x2b2   :  { %1015 = vmatpush.msra.mxu0 %v981_v33  ;;  %v1237_v33 = vld [vmem:[%s3224_s20 + $0x120] sm:$0xff] }
 0x2b4   :  { %1016 = vmatpush.msra.mxu0 %v979_v35 }
 0x2b5   :  { %v785_v36 = vpop.f32.mrf.mxu3 }
 0x2b6   :  { %1830 = vmatmul.msk.f32.gmra.mxu0 %vm818_vm4, %v785_v36  ;;  %v724_v38 = vpop.f32.mrf.mxu2  ;;  %1832 = vmatmul.msk.f32.gmra.mxu1 %vm818_vm4, %v785_v36  ;;  %v1050_v36 = vld [vmem:[%s3221_s17] sm:$0xff] }
 0x2b7   :  { %1834 = vmatmul.msk.f32.gmra.mxu2 %vm818_vm4, %v724_v38  ;;  %1836 = vmatmul.msk.f32.gmra.mxu3 %vm818_vm4, %v724_v38  ;;  %v1231_v38 = vld [vmem:[%s3224_s20 + $0xf0] sm:$0xff] }
 0x2b8   :  { %1017 = vmatpush.msra.mxu0 %v977_v37  ;;  %v1157_v37 = vld [vmem:[#allocation19] sm:$0xff] }
 0x2ba   :  { %1018 = vmatpush.msra.mxu0 %v975_v39  ;;  %v1232_v39 = vld [vmem:[%s3224_s20 + $0xf8] sm:$0xff] }
 0x2bc   :  { %1019 = vmatpush.msra.mxu0 %v973_v40  ;;  %v1229_v40 = vld [vmem:[%s3224_s20 + $0xe0] sm:$0xff] }
 0x2be   :  { %1838 = vmatmul.msk.f32.vlgmr.msrb.gmra.mxu0 %vm693_vm3, %v923_v41  ;;  %v1256_v41 = vld [vmem:[%s3224_s20 + $0x1b8] sm:$0xff] }
 0x2bf   :  { %1020 = vmatpush.msra.mxu0 %v971_v44  ;;  %v1227_v44 = vld [vmem:[%s3224_s20 + $0xd0] sm:$0xff] }
 0x2c1   :  { %1021 = vmatpush.msra.mxu0 %v969_v46  ;;  %v1228_v46 = vld [vmem:[%s3224_s20 + $0xd8] sm:$0xff] }
 0x2c3   :  { %1022 = vmatpush.msra.mxu0 %v967_v48  ;;  %v1225_v48 = vld [vmem:[%s3224_s20 + $0xc0] sm:$0xff] }
 0x2c5   :  { %1023 = vmatpush.msra.mxu0 %v965_v50  ;;  %v1226_v50 = vld [vmem:[%s3224_s20 + $0xc8] sm:$0xff] }
 0x2c6   :  { %1839 = vmatmul.msk.f32.gmra.mxu0 %vm693_vm3, %v924_v42  ;;  %v1230_v42 = vld [vmem:[%s3224_s20 + $0xe8] sm:$0xff] }
 0x2c7   :  { %1024 = vmatpush.msra.mxu0 %v963_v52  ;;  %v1131_v52 = vld [vmem:[%s3223_s19 + $0xf0] sm:$0xff] }
 0x2c9   :  { %1025 = vmatpush.msra.mxu0 %v961_v54  ;;  %v1224_v54 = vld [vmem:[%s3224_s20 + $0xb8] sm:$0xff] }
 0x2cb   :  { %1026 = vmatpush.msra.mxu0 %v959_v56  ;;  %v1129_v56 = vld [vmem:[%s3223_s19 + $0xe0] sm:$0xff] }
 0x2cd   :  { %1027 = vmatpush.msra.mxu0 %v957_v58  ;;  %v1222_v58 = vld [vmem:[%s3224_s20 + $0xa8] sm:$0xff] }
 0x2cf   :  { %1028 = vmatpush.msra.mxu0 %v955_v60  ;;  %v1127_v60 = vld [vmem:[%s3223_s19 + $0xd0] sm:$0xff] }
 0x2d1   :  { %1285 = vmatpush.msrb.mxu0 %v1255_v5  ;;  %v1242_v5 = vld [vmem:[%s3224_s20 + $0x148] sm:$0xff] }
 0x2d3   :  { %1286 = vmatpush.msrb.mxu0 %v1253_v6  ;;  %v1216_v6 = vld [vmem:[%s3224_s20 + $0x78] sm:$0xff] }
 0x2d5   :  { %1287 = vmatpush.msrb.mxu0 %v1251_v7  ;;  %v1213_v7 = vld [vmem:[%s3224_s20 + $0x60] sm:$0xff] }
 0x2d7   :  { %1288 = vmatpush.msrb.mxu0 %v1249_v10  ;;  %v1214_v10 = vld [vmem:[%s3224_s20 + $0x68] sm:$0xff] }
 0x2d9   :  { %1289 = vmatpush.msrb.mxu0 %v1247_v11  ;;  %v1211_v11 = vld [vmem:[%s3224_s20 + $0x50] sm:$0xff] }
 0x2db   :  { %1290 = vmatpush.msrb.mxu0 %v1245_v14  ;;  %v1209_v14 = vld [vmem:[%s3224_s20 + $0x40] sm:$0xff] }
 0x2dd   :  { %1291 = vmatpush.msrb.mxu0 %v1243_v16  ;;  %v1210_v16 = vld [vmem:[%s3224_s20 + $0x48] sm:$0xff] }
 0x2df   :  { %1292 = vmatpush.msrb.mxu0 %v1241_v25  ;;  %v1201_v25 = vld [vmem:[%s3224_s20] sm:$0xff] }
 0x2e1   :  { %1293 = vmatpush.msrb.mxu0 %v1239_v30  ;;  %v1126_v30 = vld [vmem:[%s3223_s19 + $0xc8] sm:$0xff] }
 0x2e3   :  { %1294 = vmatpush.msrb.mxu0 %v1237_v33  ;;  %v1120_v33 = vld [vmem:[%s3223_s19 + $0x98] sm:$0xff] }
 0x2e5   :  { %1295 = vmatpush.msrb.mxu0 %v1235_v43  ;;  %v1108_v43 = vld [vmem:[%s3223_s19 + $0x38] sm:$0xff] }
 0x2e7   :  { %1296 = vmatpush.msrb.mxu0 %v1233_v47  ;;  %v1149_v47 = vld [vmem:[%s3223_s19 + $0x180] sm:$0xff] }
 0x32b   :  { %v842_v61 = vpop.f32.mrf.mxu0  ;;  %v865_v1 = vpop.f32.mrf.mxu1 }
 0x332   :  { %v894_v3 = vpop.f32.mrf.mxu2  ;;  %v917_v4 = vpop.f32.mrf.mxu3 }
 0x333   :  { %v845_v62 = vpop.f32.mrf.mxu0  ;;  %v868_v2 = vpop.f32.mrf.mxu1  ;;  %v895_v17 = vadd.f32 %v894_v3, %v842_v61  ;;  %v918_v18 = vadd.f32 %v917_v4, %v865_v1  ;;  %v1246_v61 = vld [vmem:[%s3224_s20 + $0x168] sm:$0xff]  ;;  %v1244_v1 = vld [vmem:[%s3224_s20 + $0x158] sm:$0xff]  ;;  %v1215_v3 = vld [vmem:[%s3224_s20 + $0x70] sm:$0xff] }
 0x334   :  { %v1123_v4 = vld [vmem:[%s3223_s19 + $0xb0] sm:$0xff] }
 0x33a   :  { %v897_v12 = vpop.f32.mrf.mxu2  ;;  %v920_v13 = vpop.f32.mrf.mxu3 }
 0x33b   :  { %v948_v63 = vpop.f32.mrf.mxu0  ;;  %v898_v19 = vadd.f32 %v897_v12, %v845_v62  ;;  %v921_v20 = vadd.f32 %v920_v13, %v868_v2  ;;  %v1220_v62 = vld [vmem:[%s3224_s20 + $0x98] sm:$0xff]  ;;  %v1218_v2 = vld [vmem:[%s3224_s20 + $0x88] sm:$0xff] }
 0x33c   :  { %1840 = vmatmul.msk.f32.vlgmr.msrb.gmra.mxu1 %vm818_vm4, %v948_v63  ;;  %1842 = vmatmul.msk.f32.vlgmr.msra.gmra.mxu0 %vm818_vm4, %v948_v63  ;;  %v1217_v63 = vld [vmem:[%s3224_s20 + $0x80] sm:$0xff]  ;;  %v1238_v12 = vld [vmem:[%s3224_s20 + $0x128] sm:$0xff]  ;;  %v1212_v13 = vld [vmem:[%s3224_s20 + $0x58] sm:$0xff] }
 0x33d   :  { %1344 = vmatpush.msra.mxu0 %v1131_v52  ;;  %v1150_v52 = vld [vmem:[%s3223_s19 + $0x188] sm:$0xff] }
 0x33f   :  { %1345 = vmatpush.msra.mxu0 %v1129_v56  ;;  %v1102_v56 = vld [vmem:[%s3223_s19 + $0x8] sm:$0xff] }
 0x341   :  { %1346 = vmatpush.msra.mxu0 %v1127_v60  ;;  %v1144_v60 = vld [vmem:[%s3223_s19 + $0x158] sm:$0xff] }
 0x343   :  { %v951_v0 = vpop.f32.mrf.mxu0 }
 0x344   :  { %1841 = vmatmul.msk.f32.gmra.mxu1 %vm818_vm4, %v951_v0  ;;  %1843 = vmatmul.msk.f32.gmra.mxu0 %vm818_vm4, %v951_v0  ;;  %v1125_v0 = vld [vmem:[%s3223_s19 + $0xc0] sm:$0xff] }
 0x345   :  { %1347 = vmatpush.msra.mxu0 %v1125_v0  ;;  %v1107_v0 = vld [vmem:[%s3223_s19 + $0x30] sm:$0xff] }
 0x347   :  { %1348 = vmatpush.msra.mxu0 %v1123_v4  ;;  %v1135_v4 = vld [vmem:[%s3223_s19 + $0x110] sm:$0xff] }
 0x3b9   :  { %v1007_v8 = vpop.f32.mrf.mxu1  ;;  %v1030_v9 = vpop.f32.mrf.mxu0 }
 0x3ba   :  { %v1036_v26 = vadd.f32 %v1007_v8, %v895_v17  ;;  %v1037_v27 = vadd.f32 %v1030_v9, %v918_v18  ;;  %v1121_v8 = vld [vmem:[%s3223_s19 + $0xa0] sm:$0xff]  ;;  %v1240_v9 = vld [vmem:[%s3224_s20 + $0x138] sm:$0xff]  ;;  %v1207_v17 = vld [vmem:[%s3224_s20 + $0x30] sm:$0xff] }
 0x3bb   :  { %1349 = vmatpush.msra.mxu0 %v1121_v8  ;;  %v1234_v18 = vld [vmem:[%s3224_s20 + $0x108] sm:$0xff]  ;;  %v1133_v8 = vld [vmem:[%s3223_s19 + $0x100] sm:$0xff] }
 0x3bc   :  { %v1046_v34 = vadd.f32 %v1042_v21, %v1036_v26  ;;  %v1047_v35 = vadd.f32 %v1043_v22, %v1037_v27  ;;  %v1151_v26 = vld [vmem:[%s3223_s19 + $0x190] sm:$0xff]  ;;  %v1132_v27 = vld [vmem:[%s3223_s19 + $0xf8] sm:$0xff] }
 0x3c1   :  { %v1010_v23 = vpop.f32.mrf.mxu1  ;;  %v1033_v24 = vpop.f32.mrf.mxu0 }
 0x3c2   :  { %v1038_v28 = vadd.f32 %v1010_v23, %v898_v19  ;;  %v1039_v29 = vadd.f32 %v1033_v24, %v921_v20  ;;  %v1208_v19 = vld [vmem:[%s3224_s20 + $0x38] sm:$0xff]  ;;  %v1205_v20 = vld [vmem:[%s3224_s20 + $0x20] sm:$0xff]  ;;  %v1203_v23 = vld [vmem:[%s3224_s20 + $0x10] sm:$0xff] }
 0x3c3   :  { %v1153_v24 = vld [vmem:[%s3223_s19 + $0x1a0] sm:$0xff] }
 0x3c4   :  { %v1048_v31 = vadd.f32 %v1042_v21, %v1038_v28  ;;  %v1049_v32 = vadd.f32 %v1043_v22, %v1039_v29  ;;  %v1155_v21 = vld [vmem:[%s3223_s19 + $0x1b0] sm:$0xff]  ;;  %v1206_v22 = vld [vmem:[%s3224_s20 + $0x28] sm:$0xff]  ;;  %v1128_v29 = vld [vmem:[%s3223_s19 + $0xd8] sm:$0xff] }
 0x3c5   :  { %v1130_v28 = vld [vmem:[%s3223_s19 + $0xe8] sm:$0xff] }
 0x3c6   :  { %1844 = vmatpush.msk.msra.mxu2 %vm700_vm2, %v1048_v31  ;;  %1846 = vmatpush.msk.msra.mxu3 %vm700_vm2, %v1049_v32 }
 0x3c7   :  { %1848 = vmatpush.msk.msra.mxu1 %vm700_vm2, %v1048_v31  ;;  %v1124_v31 = vld [vmem:[%s3223_s19 + $0xb8] sm:$0xff] }
 0x3c8   :  { %1076 = vmatpush.msra.mxu2 %v1046_v34  ;;  %1096 = vmatpush.msra.mxu3 %v1047_v35 }
 0x3c9   :  { %1176 = vmatpush.msra.mxu1 %v1046_v34  ;;  %1845 = vmatmul.msk.f32.vlgmr.msra.gmra.mxu2 %vm1051_vm5, %v1050_v36  ;;  %v1118_v34 = vld [vmem:[%s3223_s19 + $0x88] sm:$0xff] }
 0x3ca   :  { %1850 = vmatpush.msk.msrb.mxu2 %vm700_vm2, %v1049_v32  ;;  %1847 = vmatmul.msk.f32.vlgmr.msra.gmra.mxu3 %vm1051_vm5, %v1050_v36  ;;  %v1122_v32 = vld [vmem:[%s3223_s19 + $0xa8] sm:$0xff] }
 0x3cb   :  { %1849 = vmatmul.msk.f32.vlgmr.msra.gmra.mxu1 %vm1051_vm5, %v1157_v37  ;;  %1261 = vmatpush.msrb.mxu3 %v1231_v38  ;;  %v1114_v36 = vld [vmem:[%s3223_s19 + $0x68] sm:$0xff]  ;;  %v1112_v38 = vld [vmem:[%s3223_s19 + $0x58] sm:$0xff] }
 0x3cc   :  { %1196 = vmatpush.msrb.mxu2 %v1047_v35  ;;  %1301 = vmatpush.msrb.mxu1 %v1232_v39  ;;  %v1116_v35 = vld [vmem:[%s3223_s19 + $0x78] sm:$0xff]  ;;  %v1202_v39 = vld [vmem:[%s3224_s20 + $0x8] sm:$0xff] }
 0x3cd   :  { %1262 = vmatpush.msrb.mxu3 %v1229_v40  ;;  %v1156_v40 = vld [vmem:[%s3223_s19 + $0x1b8] sm:$0xff] }
 0x3ce   :  { %1325 = vmatpush.msra.mxu2 %v1256_v41  ;;  %1302 = vmatpush.msrb.mxu1 %v1230_v42  ;;  %v1110_v41 = vld [vmem:[%s3223_s19 + $0x48] sm:$0xff] }
 0x3cf   :  { %1263 = vmatpush.msrb.mxu3 %v1227_v44  ;;  %v1154_v42 = vld [vmem:[%s3223_s19 + $0x1a8] sm:$0xff]  ;;  %v1119_v44 = vld [vmem:[%s3223_s19 + $0x90] sm:$0xff] }
 0x3d0   :  { %1326 = vmatpush.msra.mxu2 %v1254_v45  ;;  %1303 = vmatpush.msrb.mxu1 %v1228_v46  ;;  %v1152_v45 = vld [vmem:[%s3223_s19 + $0x198] sm:$0xff]  ;;  %v1106_v46 = vld [vmem:[%s3223_s19 + $0x28] sm:$0xff] }
 0x3d1   :  { %1851 = vmatmul.msk.f32.vlgmr.msrb.gmra.mxu2 %vm1051_vm5, %v1157_v37  ;;  %1264 = vmatpush.msrb.mxu3 %v1225_v48  ;;  %v1204_v37 = vld [vmem:[%s3224_s20 + $0x18] sm:$0xff]  ;;  %v1117_v48 = vld [vmem:[%s3223_s19 + $0x80] sm:$0xff] }
 0x3d2   :  { %1327 = vmatpush.msra.mxu2 %v1252_v49  ;;  %1304 = vmatpush.msrb.mxu1 %v1226_v50  ;;  %v1147_v49 = vld [vmem:[%s3223_s19 + $0x170] sm:$0xff] }
 0x3d3   :  { %1265 = vmatpush.msrb.mxu3 %v1223_v51  ;;  %1350 = vmatpush.msra.mxu0 %v1119_v44  ;;  %v1115_v50 = vld [vmem:[%s3223_s19 + $0x70] sm:$0xff]  ;;  %v1145_v51 = vld [vmem:[%s3223_s19 + $0x160] sm:$0xff] }
 0x3d4   :  { %1328 = vmatpush.msra.mxu2 %v1250_v53  ;;  %1305 = vmatpush.msrb.mxu1 %v1224_v54  ;;  %v1104_v53 = vld [vmem:[%s3223_s19 + $0x18] sm:$0xff]  ;;  %v1113_v54 = vld [vmem:[%s3223_s19 + $0x60] sm:$0xff] }
 0x3d5   :  { %1266 = vmatpush.msrb.mxu3 %v1221_v55  ;;  %1351 = vmatpush.msra.mxu0 %v1117_v48  ;;  %v1148_v55 = vld [vmem:[%s3223_s19 + $0x178] sm:$0xff] }
 0x3d6   :  { %1329 = vmatpush.msra.mxu2 %v1248_v57  ;;  %1306 = vmatpush.msrb.mxu1 %v1222_v58  ;;  %v1143_v57 = vld [vmem:[%s3223_s19 + $0x150] sm:$0xff]  ;;  %v1146_v58 = vld [vmem:[%s3223_s19 + $0x168] sm:$0xff] }
 0x3d7   :  { %1267 = vmatpush.msrb.mxu3 %v1219_v59  ;;  %1352 = vmatpush.msra.mxu0 %v1115_v50  ;;  %v1111_v59 = vld [vmem:[%s3223_s19 + $0x50] sm:$0xff] }
 0x3d8   :  { %1330 = vmatpush.msra.mxu2 %v1246_v61  ;;  %1307 = vmatpush.msrb.mxu1 %v1220_v62  ;;  %v1141_v61 = vld [vmem:[%s3223_s19 + $0x140] sm:$0xff] }
 0x3d9   :  { %1268 = vmatpush.msrb.mxu3 %v1217_v63  ;;  %1353 = vmatpush.msra.mxu0 %v1113_v54  ;;  %v1109_v62 = vld [vmem:[%s3223_s19 + $0x40] sm:$0xff]  ;;  %v1139_v63 = vld [vmem:[%s3223_s19 + $0x130] sm:$0xff] }
 0x3da   :  { %1331 = vmatpush.msra.mxu2 %v1244_v1  ;;  %1308 = vmatpush.msrb.mxu1 %v1218_v2  ;;  %v1137_v1 = vld [vmem:[%s3223_s19 + $0x120] sm:$0xff] }
 0x3db   :  { %1269 = vmatpush.msrb.mxu3 %v1215_v3  ;;  %1354 = vmatpush.msra.mxu0 %v1111_v59  ;;  %v1105_v2 = vld [vmem:[%s3223_s19 + $0x20] sm:$0xff]  ;;  %v1142_v3 = vld [vmem:[%s3223_s19 + $0x148] sm:$0xff] }
 0x3dc   :  { %1332 = vmatpush.msra.mxu2 %v1242_v5  ;;  %1309 = vmatpush.msrb.mxu1 %v1216_v6  ;;  %v1140_v5 = vld [vmem:[%s3223_s19 + $0x138] sm:$0xff]  ;;  %v1103_v6 = vld [vmem:[%s3223_s19 + $0x10] sm:$0xff] }
 0x3dd   :  { %1270 = vmatpush.msrb.mxu3 %v1213_v7  ;;  %1355 = vmatpush.msra.mxu0 %v1109_v62  ;;  %v1138_v7 = vld [vmem:[%s3223_s19 + $0x128] sm:$0xff]  ;;  %v1482_v62 = vld [vmem:[#allocation24 + $0x28] sm:$0xff] }
 0x3de   :  { %1333 = vmatpush.msra.mxu2 %v1240_v9  ;;  %1310 = vmatpush.msrb.mxu1 %v1214_v10  ;;  %v1136_v9 = vld [vmem:[%s3223_s19 + $0x118] sm:$0xff]  ;;  %v1101_v10 = vld [vmem:[%s3223_s19] sm:$0xff] }
 0x3df   :  { %1271 = vmatpush.msrb.mxu3 %v1211_v11  ;;  %1356 = vmatpush.msra.mxu0 %v1107_v0  ;;  %v1134_v11 = vld [vmem:[%s3223_s19 + $0x108] sm:$0xff]  ;;  %v1598_v0 = vld [vmem:[#allocation24 + $0x3c8] sm:$0xff] }
 0x3e0   :  { %1334 = vmatpush.msra.mxu2 %v1238_v12  ;;  %1311 = vmatpush.msrb.mxu1 %v1212_v13 }
 0x3e1   :  { %1272 = vmatpush.msrb.mxu3 %v1209_v14  ;;  %1357 = vmatpush.msra.mxu0 %v1105_v2  ;;  %v1478_v2 = vld [vmem:[#allocation24 + $0x8] sm:$0xff] }
 0x3e2   :  { %1335 = vmatpush.msra.mxu2 %v1236_v15  ;;  %1312 = vmatpush.msrb.mxu1 %v1210_v16  ;;  %v1538_v16 = vld [vmem:[#allocation24 + $0x1e8] sm:$0xff] }
 0x3e3   :  { %1273 = vmatpush.msrb.mxu3 %v1207_v17  ;;  %1358 = vmatpush.msra.mxu0 %v1103_v6  ;;  %v1534_v17 = vld [vmem:[#allocation24 + $0x1c8] sm:$0xff]  ;;  %v1485_v6 = vld [vmem:[#allocation24 + $0x40] sm:$0xff] }
 0x3e4   :  { %1336 = vmatpush.msra.mxu2 %v1234_v18  ;;  %1313 = vmatpush.msrb.mxu1 %v1208_v19  ;;  %v1530_v18 = vld [vmem:[#allocation24 + $0x1a8] sm:$0xff]  ;;  %v1537_v19 = vld [vmem:[#allocation24 + $0x1e0] sm:$0xff] }
 0x3e5   :  { %1274 = vmatpush.msrb.mxu3 %v1205_v20  ;;  %1359 = vmatpush.msra.mxu0 %v1101_v10  ;;  %v1526_v20 = vld [vmem:[#allocation24 + $0x188] sm:$0xff]  ;;  %v1481_v10 = vld [vmem:[#allocation24 + $0x20] sm:$0xff] }
 0x3e6   :  { %1368 = vmatpush.msrb.mxu2 %v1155_v21  ;;  %1314 = vmatpush.msrb.mxu1 %v1206_v22  ;;  %v1533_v21 = vld [vmem:[#allocation24 + $0x1c0] sm:$0xff]  ;;  %v1522_v22 = vld [vmem:[#allocation24 + $0x168] sm:$0xff] }
 0x3e7   :  { %1275 = vmatpush.msrb.mxu3 %v1203_v23  ;;  %v1529_v23 = vld [vmem:[#allocation24 + $0x1a0] sm:$0xff] }
 0x3e8   :  { %1369 = vmatpush.msrb.mxu2 %v1153_v24  ;;  %1315 = vmatpush.msrb.mxu1 %v1204_v37  ;;  %v1518_v24 = vld [vmem:[#allocation24 + $0x148] sm:$0xff] }
 0x3e9   :  { %1276 = vmatpush.msrb.mxu3 %v1201_v25  ;;  %v1525_v25 = vld [vmem:[#allocation24 + $0x180] sm:$0xff] }
 0x3ea   :  { %1370 = vmatpush.msrb.mxu2 %v1151_v26  ;;  %1316 = vmatpush.msrb.mxu1 %v1202_v39 }
 0x3eb   :  { %1384 = vmatpush.msra.mxu3 %v1132_v27  ;;  %v1514_v27 = vld [vmem:[#allocation24 + $0x128] sm:$0xff] }
 0x3ec   :  { %1408 = vmatpush.msra.mxu1 %v1156_v40  ;;  %1371 = vmatpush.msrb.mxu2 %v1149_v47  ;;  %v1498_v40 = vld [vmem:[#allocation24 + $0xa8] sm:$0xff] }
 0x3ed   :  { %1385 = vmatpush.msra.mxu3 %v1130_v28  ;;  %v1521_v28 = vld [vmem:[#allocation24 + $0x160] sm:$0xff] }
 0x3ee   :  { %1409 = vmatpush.msra.mxu1 %v1154_v42  ;;  %1372 = vmatpush.msrb.mxu2 %v1147_v49 }
 0x3ef   :  { %1386 = vmatpush.msra.mxu3 %v1128_v29 }
 0x3f0   :  { %1410 = vmatpush.msra.mxu1 %v1152_v45  ;;  %1373 = vmatpush.msrb.mxu2 %v1145_v51  ;;  %v1494_v45 = vld [vmem:[#allocation24 + $0x88] sm:$0xff] }
 0x3f1   :  { %1387 = vmatpush.msra.mxu3 %v1126_v30  ;;  %v1490_v51 = vld [vmem:[#allocation24 + $0x68] sm:$0xff] }
 0x3f2   :  { %1411 = vmatpush.msra.mxu1 %v1150_v52  ;;  %1374 = vmatpush.msrb.mxu2 %v1143_v57  ;;  %v1497_v52 = vld [vmem:[#allocation24 + $0xa0] sm:$0xff]  ;;  %v1486_v57 = vld [vmem:[#allocation24 + $0x48] sm:$0xff] }
 0x3f3   :  { %1388 = vmatpush.msra.mxu3 %v1124_v31  ;;  %v1510_v31 = vld [vmem:[#allocation24 + $0x108] sm:$0xff] }
 0x3f4   :  { %1412 = vmatpush.msra.mxu1 %v1148_v55  ;;  %1375 = vmatpush.msrb.mxu2 %v1141_v61 }
 0x3f5   :  { %1389 = vmatpush.msra.mxu3 %v1122_v32  ;;  %v1517_v32 = vld [vmem:[#allocation24 + $0x140] sm:$0xff] }
 0x3f6   :  { %1413 = vmatpush.msra.mxu1 %v1146_v58  ;;  %1376 = vmatpush.msrb.mxu2 %v1139_v63  ;;  %v1493_v58 = vld [vmem:[#allocation24 + $0x80] sm:$0xff] }
 0x3f7   :  { %1390 = vmatpush.msra.mxu3 %v1120_v33  ;;  %v1506_v33 = vld [vmem:[#allocation24 + $0xe8] sm:$0xff]  ;;  %v1489_v63 = vld [vmem:[#allocation24 + $0x60] sm:$0xff] }
 0x3f8   :  { %1414 = vmatpush.msra.mxu1 %v1144_v60  ;;  %1377 = vmatpush.msrb.mxu2 %v1137_v1  ;;  %v1602_v60 = vld [vmem:[#allocation24 + $0x3e8] sm:$0xff] }
 0x3f9   :  { %1391 = vmatpush.msra.mxu3 %v1118_v34  ;;  %v1513_v34 = vld [vmem:[#allocation24 + $0x120] sm:$0xff] }
 0x3fa   :  { %1415 = vmatpush.msra.mxu1 %v1142_v3  ;;  %1378 = vmatpush.msrb.mxu2 %v1135_v4  ;;  %v1601_v3 = vld [vmem:[#allocation24 + $0x3e0] sm:$0xff]  ;;  %v1594_v4 = vld [vmem:[#allocation24 + $0x3a8] sm:$0xff] }
 0x3fb   :  { %1392 = vmatpush.msra.mxu3 %v1116_v35  ;;  %v1502_v35 = vld [vmem:[#allocation24 + $0xc8] sm:$0xff] }
 0x3fc   :  { %1416 = vmatpush.msra.mxu1 %v1140_v5  ;;  %1379 = vmatpush.msrb.mxu2 %v1133_v8  ;;  %v1540_v5 = vld [vmem:[#allocation24 + $0x1f8] sm:$0xff]  ;;  %v1590_v8 = vld [vmem:[#allocation24 + $0x388] sm:$0xff] }
 0x3fd   :  { %1393 = vmatpush.msra.mxu3 %v1114_v36  ;;  %v1509_v36 = vld [vmem:[#allocation24 + $0x100] sm:$0xff] }
 0x3fe   :  { %1417 = vmatpush.msra.mxu1 %v1138_v7  ;;  %v1597_v7 = vld [vmem:[#allocation24 + $0x3c0] sm:$0xff] }
 0x3ff   :  { %1394 = vmatpush.msra.mxu3 %v1112_v38  ;;  %v1424_v38 = vld [vmem:[#allocation21] sm:$0x3] }
 0x400   :  { %1418 = vmatpush.msra.mxu1 %v1136_v9  ;;  %v1427_v44 = vperm.slane %v1424_v38, 1  ;;  %v1426_v54 = vperm.slane %v1424_v38, 0  ;;  %v1536_v9 = vld [vmem:[#allocation24 + $0x1d8] sm:$0xff] }
 0x401   :  { %1395 = vmatpush.msra.mxu3 %v1110_v41  ;;  %v1505_v41 = vld [vmem:[#allocation24 + $0xe0] sm:$0xff]  ;;  %v1508_v38 = vld [vmem:[#allocation24 + $0xf8] sm:$0xff] }
 0x402   :  { %1419 = vmatpush.msra.mxu1 %v1134_v11  ;;  %v1593_v11 = vld [vmem:[#allocation24 + $0x3a0] sm:$0xff] }
 0x403   :  { %1396 = vmatpush.msra.mxu3 %v1108_v43 }
 0x405   :  { %1397 = vmatpush.msra.mxu3 %v1106_v46  ;;  %v1501_v46 = vld [vmem:[#allocation24 + $0xc0] sm:$0xff] }
 0x407   :  { %1398 = vmatpush.msra.mxu3 %v1104_v53 }
 0x409   :  { %1399 = vmatpush.msra.mxu3 %v1102_v56  ;;  %v1432_v56 = vld [vmem:[#allocation22] sm:$0xff] }
 0x448   :  { %v1178_v12 = vpop.f32.mrf.mxu1 }
 0x449   :  { %1277 = vmatmul.f32.vlgmr.msrb.gmra.mxu3 %v1178_v12  ;;  %1317 = vmatmul.f32.vlgmr.msrb.gmra.mxu1 %v1178_v12  ;;  %v1586_v12 = vld [vmem:[#allocation24 + $0x368] sm:$0xff] }
 0x44a   :  { %1655 = vmatpush.msrb.mxu3 %v1538_v16  ;;  %1615 = vmatpush.msrb.mxu1 %v1537_v19  ;;  %v1582_v16 = vld [vmem:[#allocation24 + $0x348] sm:$0xff]  ;;  %v1585_v19 = vld [vmem:[#allocation24 + $0x360] sm:$0xff] }
 0x44c   :  { %v1078_v13 = vpop.f32.mrf.mxu2  ;;  %1656 = vmatpush.msrb.mxu3 %v1534_v17  ;;  %1616 = vmatpush.msrb.mxu1 %v1533_v21  ;;  %v1539_v17 = vld [vmem:[#allocation24 + $0x1f0] sm:$0xff] }
 0x44d   :  { %v1098_v14 = vpop.f32.mrf.mxu3  ;;  %v1535_v21 = vld [vmem:[#allocation24 + $0x1d0] sm:$0xff] }
 0x44e   :  { %1657 = vmatpush.msrb.mxu3 %v1530_v18  ;;  %1617 = vmatpush.msrb.mxu1 %v1529_v23  ;;  %v1528_v18 = vld [vmem:[#allocation24 + $0x198] sm:$0xff]  ;;  %v1581_v23 = vld [vmem:[#allocation24 + $0x340] sm:$0xff] }
 0x450   :  { %1658 = vmatpush.msrb.mxu3 %v1526_v20  ;;  %1618 = vmatpush.msrb.mxu1 %v1525_v25  ;;  %v1578_v20 = vld [vmem:[#allocation24 + $0x328] sm:$0xff]  ;;  %v1531_v25 = vld [vmem:[#allocation24 + $0x1b0] sm:$0xff] }
 0x451   :  { %1400 = vmatmul.f32.vlgmr.msra.gmra.mxu3 %v1078_v13  ;;  %1855 = vmatmul.msk.f32.vlgmr.msra.gmra.mxu1 %vm1257_vm6, %v1098_v14 }
 0x452   :  { %1659 = vmatpush.msrb.mxu3 %v1522_v22  ;;  %1619 = vmatpush.msrb.mxu1 %v1521_v28  ;;  %v1524_v22 = vld [vmem:[#allocation24 + $0x178] sm:$0xff]  ;;  %v1570_v28 = vld [vmem:[#allocation24 + $0x2e8] sm:$0xff] }
 0x454   :  { %v1198_v15 = vpop.f32.mrf.mxu2  ;;  %1660 = vmatpush.msrb.mxu3 %v1518_v24  ;;  %1620 = vmatpush.msrb.mxu1 %v1517_v32  ;;  %v1574_v24 = vld [vmem:[#allocation24 + $0x308] sm:$0xff] }
 0x455   :  { %1853 = vmatmul.msk.f32.vlgmr.msra.gmra.mxu2 %vm1257_vm6, %v1198_v15  ;;  %1852 = vmatmul.msk.f32.vlgmr.msrb.gmra.mxu0 %vm1257_vm6, %v1198_v15  ;;  %v1589_v15 = vld [vmem:[#allocation24 + $0x380] sm:$0xff]  ;;  %v1566_v32 = vld [vmem:[#allocation24 + $0x2c8] sm:$0xff] }
 0x456   :  { %1661 = vmatpush.msrb.mxu3 %v1514_v27  ;;  %1621 = vmatpush.msrb.mxu1 %v1513_v34  ;;  %v1577_v27 = vld [vmem:[#allocation24 + $0x320] sm:$0xff]  ;;  %v1512_v34 = vld [vmem:[#allocation24 + $0x118] sm:$0xff] }
 0x458   :  { %1662 = vmatpush.msrb.mxu3 %v1510_v31  ;;  %1622 = vmatpush.msrb.mxu1 %v1509_v36  ;;  %v1573_v31 = vld [vmem:[#allocation24 + $0x300] sm:$0xff]  ;;  %v1562_v36 = vld [vmem:[#allocation24 + $0x2a8] sm:$0xff] }
 0x45a   :  { %1663 = vmatpush.msrb.mxu3 %v1506_v33  ;;  %1623 = vmatpush.msrb.mxu1 %v1505_v41  ;;  %v1523_v33 = vld [vmem:[#allocation24 + $0x170] sm:$0xff] }
 0x45b   :  { %v1515_v41 = vld [vmem:[#allocation24 + $0x130] sm:$0xff] }
 0x45c   :  { %1664 = vmatpush.msrb.mxu3 %v1502_v35  ;;  %1624 = vmatpush.msrb.mxu1 %v1501_v46  ;;  %v1569_v35 = vld [vmem:[#allocation24 + $0x2e0] sm:$0xff]  ;;  %v1500_v46 = vld [vmem:[#allocation24 + $0xb8] sm:$0xff] }
 0x45d   :  { %1854 = vmatmul.msk.f32.vlgmr.msrb.gmra.mxu2 %vm1257_vm6, %v1098_v14  ;;  %1360 = vmatmul.f32.vlgmr.msra.gmra.mxu0 %v1078_v13  ;;  %v1532_v13 = vld [vmem:[#allocation24 + $0x1b8] sm:$0xff]  ;;  %v1477_v14 = vld [vmem:[#allocation24] sm:$0xff] }
 0x45e   :  { %1665 = vmatpush.msrb.mxu3 %v1498_v40  ;;  %1625 = vmatpush.msrb.mxu1 %v1497_v52  ;;  %v1558_v40 = vld [vmem:[#allocation24 + $0x288] sm:$0xff] }
 0x45f   :  { %v1542_v52 = vld [vmem:[#allocation24 + $0x208] sm:$0xff] }
 0x460   :  { %1666 = vmatpush.msrb.mxu3 %v1494_v45  ;;  %1626 = vmatpush.msrb.mxu1 %v1493_v58  ;;  %v1511_v45 = vld [vmem:[#allocation24 + $0x110] sm:$0xff]  ;;  %v1596_v58 = vld [vmem:[#allocation24 + $0x3b8] sm:$0xff] }
 0x462   :  { %1667 = vmatpush.msrb.mxu3 %v1490_v51  ;;  %1627 = vmatpush.msrb.mxu1 %v1489_v63  ;;  %v1549_v51 = vld [vmem:[#allocation24 + $0x240] sm:$0xff]  ;;  %v1591_v63 = vld [vmem:[#allocation24 + $0x390] sm:$0xff] }
 0x464   :  { %1668 = vmatpush.msrb.mxu3 %v1486_v57  ;;  %1628 = vmatpush.msrb.mxu1 %v1485_v6  ;;  %v1603_v57 = vld [vmem:[#allocation24 + $0x3f0] sm:$0xff] }
 0x465   :  { %v1571_v6 = vld [vmem:[#allocation24 + $0x2f0] sm:$0xff] }
 0x466   :  { %1669 = vmatpush.msrb.mxu3 %v1482_v62  ;;  %1629 = vmatpush.msrb.mxu1 %v1481_v10  ;;  %v1588_v62 = vld [vmem:[#allocation24 + $0x378] sm:$0xff] }
 0x467   :  { %v1568_v10 = vld [vmem:[#allocation24 + $0x2d8] sm:$0xff] }
 0x468   :  { %1670 = vmatpush.msrb.mxu3 %v1478_v2  ;;  %1630 = vmatpush.msrb.mxu1 %v1477_v14  ;;  %v1580_v2 = vld [vmem:[#allocation24 + $0x338] sm:$0xff]  ;;  %v1559_v14 = vld [vmem:[#allocation24 + $0x290] sm:$0xff] }
 0x46a   :  { %1735 = vmatpush.msra.mxu3 %v1540_v5  ;;  %1695 = vmatpush.msra.mxu1 %v1539_v17  ;;  %v1575_v5 = vld [vmem:[#allocation24 + $0x310] sm:$0xff] }
 0x46b   :  { %v1555_v17 = vld [vmem:[#allocation24 + $0x270] sm:$0xff] }
 0x46c   :  { %1736 = vmatpush.msra.mxu3 %v1536_v9  ;;  %1696 = vmatpush.msra.mxu1 %v1535_v21  ;;  %v1572_v9 = vld [vmem:[#allocation24 + $0x2f8] sm:$0xff] }
 0x46d   :  { %v1552_v21 = vld [vmem:[#allocation24 + $0x258] sm:$0xff] }
 0x46e   :  { %1737 = vmatpush.msra.mxu3 %v1532_v13  ;;  %1697 = vmatpush.msra.mxu1 %v1531_v25  ;;  %v1507_v13 = vld [vmem:[#allocation24 + $0xf0] sm:$0xff]  ;;  %v1488_v25 = vld [vmem:[#allocation24 + $0x58] sm:$0xff] }
 0x470   :  { %1738 = vmatpush.msra.mxu3 %v1528_v18  ;;  %v1556_v18 = vld [vmem:[#allocation24 + $0x278] sm:$0xff] }
 0x472   :  { %1739 = vmatpush.msra.mxu3 %v1524_v22  ;;  %v1496_v22 = vld [vmem:[#allocation24 + $0x98] sm:$0xff] }
 0x4c6   :  { %v1318_v30 = vpop.f32.mrf.mxu1 }
 0x4cc   :  { %v1278_v26 = vpop.f32.mrf.mxu3 }
 0x4ce   :  { %v1421_v48 = vpop.f32.mrf.mxu1 }
 0x4d2   :  { %v1298_v29 = vpop.f32.mrf.mxu0 }
 0x4d3   :  { %v1299_v49 = vadd.f32 %v1298_v29, %v1278_v26  ;;  %v1520_v26 = vld [vmem:[#allocation24 + $0x158] sm:$0xff]  ;;  %v1527_v29 = vld [vmem:[#allocation24 + $0x190] sm:$0xff] }
 0x4d4   :  { %v1401_v42 = vpop.f32.mrf.mxu3  ;;  %1740 = vmatpush.msra.mxu3 %v1520_v26  ;;  %1698 = vmatpush.msra.mxu1 %v1527_v29  ;;  %v1491_v26 = vld [vmem:[#allocation24 + $0x70] sm:$0xff]  ;;  %v1548_v29 = vld [vmem:[#allocation24 + $0x238] sm:$0xff] }
 0x4d6   :  { %1699 = vmatpush.msra.mxu1 %v1523_v33  ;;  %v1480_v33 = vld [vmem:[#allocation24 + $0x18] sm:$0xff] }
 0x4d8   :  { %v1338_v37 = vpop.f32.mrf.mxu2 }
 0x4d9   :  { %v1339_v39 = vadd.f32 %v1338_v37, %v1318_v30  ;;  %v1516_v30 = vld [vmem:[#allocation24 + $0x138] sm:$0xff]  ;;  %v1519_v37 = vld [vmem:[#allocation24 + $0x150] sm:$0xff] }
 0x4da   :  { %v1361_v47 = vpop.f32.mrf.mxu0  ;;  %1741 = vmatpush.msra.mxu3 %v1516_v30  ;;  %1700 = vmatpush.msra.mxu1 %v1519_v37  ;;  %v1484_v30 = vld [vmem:[#allocation24 + $0x38] sm:$0xff] }
 0x4db   :  { %v1402_v43 = vadd.f32 %v1401_v42, %v1339_v39  ;;  %v1362_v53 = vadd.f32 %v1361_v47, %v1299_v49  ;;  %v1565_v39 = vld [vmem:[#allocation24 + $0x2c0] sm:$0xff]  ;;  %v1504_v42 = vld [vmem:[#allocation24 + $0xd8] sm:$0xff] }
 0x4dc   :  { %1742 = vmatpush.msra.mxu3 %v1512_v34  ;;  %v1557_v47 = vld [vmem:[#allocation24 + $0x280] sm:$0xff]  ;;  %1701 = vmatpush.msra.mxu1 %v1515_v41  ;;  %v1483_v34 = vld [vmem:[#allocation24 + $0x30] sm:$0xff] }
 0x4dd   :  { %v1422_v50 = vadd.f32 %v1421_v48, %v1402_v43  ;;  %v1561_v43 = vld [vmem:[#allocation24 + $0x2a0] sm:$0xff]  ;;  %v1550_v48 = vld [vmem:[#allocation24 + $0x248] sm:$0xff] }
 0x4de   :  { %1743 = vmatpush.msra.mxu3 %v1508_v38  ;;  %v1553_v49 = vld [vmem:[#allocation24 + $0x260] sm:$0xff]  ;;  %1702 = vmatpush.msra.mxu1 %v1511_v45  ;;  %v1605_v38 = vld [vmem:[%s3254_s12] sm:$0xf] }
 0x4df   :  { %v1431_v55 = vadd.f32 %v1427_v44, %v1422_v50  ;;  %v1554_v44 = vld [vmem:[#allocation24 + $0x268] sm:$0xff]  ;;  %v1609_v45 = vperm.slane %v1605_v38, 2 }
 0x4e0   :  { %v1381_v59 = vpop.f32.mrf.mxu2  ;;  %1744 = vmatpush.msra.mxu3 %v1504_v42  ;;  %v1546_v50 = vld [vmem:[#allocation24 + $0x228] sm:$0xff]  ;;  %1703 = vmatpush.msra.mxu1 %v1507_v13 }
 0x4e1   :  { %v1382_v61 = vadd.f32 %v1381_v59, %v1362_v53  ;;  %1472 = vmatpush.msrb.mxu0 %v1431_v55  ;;  %v1604_v53 = vld [vmem:[#allocation24 + $0x3f8] sm:$0xff]  ;;  %v1599_v59 = vld [vmem:[#allocation24 + $0x3d0] sm:$0xff] }
 0x4e2   :  { %1857 = vmatmul.msk.f32.vlgmr.msrb.gmra.mxu0 %vm1433_vm7, %v1432_v56  ;;  %1745 = vmatpush.msra.mxu3 %v1500_v46  ;;  %v1600_v55 = vld [vmem:[#allocation24 + $0x3d8] sm:$0xff] }
 0x4e3   :  { %v1430_v1 = vadd.f32 %v1426_v54, %v1382_v61  ;;  %1675 = vmatpush.msra.mxu0 %v1602_v60  ;;  %v1545_v54 = vld [vmem:[#allocation24 + $0x220] sm:$0xff]  ;;  %v1592_v60 = vld [vmem:[#allocation24 + $0x398] sm:$0xff]  ;;  %v1595_v61 = vld [vmem:[#allocation24 + $0x3b0] sm:$0xff] }
 0x4e4   :  { %1746 = vmatpush.msra.mxu3 %v1496_v22 }
 0x4e5   :  { %1452 = vmatpush.msra.mxu2 %v1430_v1  ;;  %1676 = vmatpush.msra.mxu0 %v1598_v0  ;;  %v1584_v0 = vld [vmem:[#allocation24 + $0x358] sm:$0xff]  ;;  %v1587_v1 = vld [vmem:[#allocation24 + $0x370] sm:$0xff] }
 0x4e6   :  { %1856 = vmatmul.msk.f32.vlgmr.msra.gmra.mxu2 %vm1433_vm7, %v1432_v56  ;;  %v1541_v56 = vld [vmem:[#allocation24 + $0x200] sm:$0xff] }
 0x4e7   :  { %1635 = vmatpush.msrb.mxu2 %v1601_v3  ;;  %1677 = vmatpush.msra.mxu0 %v1594_v4  ;;  %v1583_v3 = vld [vmem:[#allocation24 + $0x350] sm:$0xff] }
 0x4e8   :  { %v1579_v4 = vld [vmem:[#allocation24 + $0x330] sm:$0xff] }
 0x4e9   :  { %1636 = vmatpush.msrb.mxu2 %v1597_v7  ;;  %1678 = vmatpush.msra.mxu0 %v1590_v8  ;;  %v1567_v7 = vld [vmem:[#allocation24 + $0x2d0] sm:$0xff]  ;;  %v1576_v8 = vld [vmem:[#allocation24 + $0x318] sm:$0xff] }
 0x4eb   :  { %1637 = vmatpush.msrb.mxu2 %v1593_v11  ;;  %1679 = vmatpush.msra.mxu0 %v1586_v12  ;;  %v1563_v11 = vld [vmem:[#allocation24 + $0x2b0] sm:$0xff]  ;;  %v1564_v12 = vld [vmem:[#allocation24 + $0x2b8] sm:$0xff] }
 0x4ed   :  { %1638 = vmatpush.msrb.mxu2 %v1589_v15  ;;  %1680 = vmatpush.msra.mxu0 %v1582_v16  ;;  %v1560_v15 = vld [vmem:[#allocation24 + $0x298] sm:$0xff]  ;;  %v1503_v16 = vld [vmem:[#allocation24 + $0xd0] sm:$0xff] }
 0x4ee   :  { %1704 = vmatpush.msra.mxu1 %v1503_v16 }
 0x4ef   :  { %1639 = vmatpush.msrb.mxu2 %v1585_v19  ;;  %1681 = vmatpush.msra.mxu0 %v1578_v20  ;;  %v1499_v19 = vld [vmem:[#allocation24 + $0xb0] sm:$0xff] }
 0x4f0   :  { %v1551_v20 = vld [vmem:[#allocation24 + $0x250] sm:$0xff]  ;;  %1705 = vmatpush.msra.mxu1 %v1499_v19 }
 0x4f1   :  { %1640 = vmatpush.msrb.mxu2 %v1581_v23  ;;  %1682 = vmatpush.msra.mxu0 %v1574_v24  ;;  %v1492_v23 = vld [vmem:[#allocation24 + $0x78] sm:$0xff]  ;;  %v1495_v24 = vld [vmem:[#allocation24 + $0x90] sm:$0xff] }
 0x4f2   :  { %1706 = vmatpush.msra.mxu1 %v1495_v24  ;;  %1747 = vmatpush.msra.mxu3 %v1492_v23 }
 0x4f3   :  { %1641 = vmatpush.msrb.mxu2 %v1577_v27  ;;  %1683 = vmatpush.msra.mxu0 %v1570_v28  ;;  %v1547_v27 = vld [vmem:[#allocation24 + $0x230] sm:$0xff] }
 0x4f4   :  { %v1543_v28 = vld [vmem:[#allocation24 + $0x210] sm:$0xff]  ;;  %1707 = vmatpush.msra.mxu1 %v1491_v26  ;;  %1748 = vmatpush.msra.mxu3 %v1488_v25 }
 0x4f5   :  { %1642 = vmatpush.msrb.mxu2 %v1573_v31  ;;  %1684 = vmatpush.msra.mxu0 %v1566_v32  ;;  %v1544_v31 = vld [vmem:[#allocation24 + $0x218] sm:$0xff]  ;;  %v1487_v32 = vld [vmem:[#allocation24 + $0x50] sm:$0xff] }
 0x4f6   :  { %1708 = vmatpush.msra.mxu1 %v1487_v32  ;;  %1749 = vmatpush.msra.mxu3 %v1484_v30 }
 0x4f7   :  { %1643 = vmatpush.msrb.mxu2 %v1569_v35  ;;  %1685 = vmatpush.msra.mxu0 %v1562_v36  ;;  %v1479_v35 = vld [vmem:[#allocation24 + $0x10] sm:$0xff] }
 0x4f8   :  { %1709 = vmatpush.msra.mxu1 %v1483_v34  ;;  %1750 = vmatpush.msra.mxu3 %v1480_v33 }
 0x4f9   :  { %1644 = vmatpush.msrb.mxu2 %v1565_v39  ;;  %1686 = vmatpush.msra.mxu0 %v1558_v40  ;;  %v1607_v39 = vperm.slane %v1605_v38, 0 }
 0x4fa   :  { %1710 = vmatpush.msra.mxu1 %v1479_v35 }
 0x4fb   :  { %1645 = vmatpush.msrb.mxu2 %v1561_v43  ;;  %1687 = vmatpush.msra.mxu0 %v1554_v44  ;;  %v1608_v43 = vperm.slane %v1605_v38, 1 }
 0x4fd   :  { %1646 = vmatpush.msrb.mxu2 %v1557_v47  ;;  %1688 = vmatpush.msra.mxu0 %v1550_v48 }
 0x4ff   :  { %1647 = vmatpush.msrb.mxu2 %v1553_v49  ;;  %1689 = vmatpush.msra.mxu0 %v1546_v50 }
 0x501   :  { %1648 = vmatpush.msrb.mxu2 %v1549_v51  ;;  %1690 = vmatpush.msra.mxu0 %v1542_v52 }
 0x503   :  { %1755 = vmatpush.msrb.mxu0 %v1604_v53  ;;  %1649 = vmatpush.msrb.mxu2 %v1545_v54  ;;  %v1610_v53 = vperm.slane %v1605_v38, 3 }
 0x505   :  { %1756 = vmatpush.msrb.mxu0 %v1600_v55  ;;  %1650 = vmatpush.msrb.mxu2 %v1541_v56 }
 0x507   :  { %1715 = vmatpush.msra.mxu2 %v1603_v57  ;;  %1757 = vmatpush.msrb.mxu0 %v1596_v58 }
 0x509   :  { %1716 = vmatpush.msra.mxu2 %v1599_v59  ;;  %1758 = vmatpush.msrb.mxu0 %v1592_v60 }
 0x50b   :  { %1717 = vmatpush.msra.mxu2 %v1595_v61  ;;  %1759 = vmatpush.msrb.mxu0 %v1588_v62 }
 0x50d   :  { %1718 = vmatpush.msra.mxu2 %v1591_v63  ;;  %1760 = vmatpush.msrb.mxu0 %v1584_v0 }
 0x50f   :  { %1719 = vmatpush.msra.mxu2 %v1587_v1  ;;  %1761 = vmatpush.msrb.mxu0 %v1580_v2 }
 0x511   :  { %1720 = vmatpush.msra.mxu2 %v1583_v3  ;;  %1762 = vmatpush.msrb.mxu0 %v1576_v8 }
 0x513   :  { %1721 = vmatpush.msra.mxu2 %v1579_v4  ;;  %1763 = vmatpush.msrb.mxu0 %v1572_v9 }
 0x515   :  { %1722 = vmatpush.msra.mxu2 %v1575_v5  ;;  %1764 = vmatpush.msrb.mxu0 %v1568_v10 }
 0x517   :  { %1723 = vmatpush.msra.mxu2 %v1571_v6  ;;  %1765 = vmatpush.msrb.mxu0 %v1564_v12 }
 0x519   :  { %1724 = vmatpush.msra.mxu2 %v1567_v7  ;;  %1766 = vmatpush.msrb.mxu0 %v1560_v15 }
 0x51b   :  { %1725 = vmatpush.msra.mxu2 %v1563_v11  ;;  %1767 = vmatpush.msrb.mxu0 %v1556_v18 }
 0x51d   :  { %1726 = vmatpush.msra.mxu2 %v1559_v14  ;;  %1768 = vmatpush.msrb.mxu0 %v1552_v21 }
 0x51f   :  { %1727 = vmatpush.msra.mxu2 %v1555_v17  ;;  %1769 = vmatpush.msrb.mxu0 %v1548_v29 }
 0x521   :  { %1728 = vmatpush.msra.mxu2 %v1551_v20  ;;  %1770 = vmatpush.msrb.mxu0 %v1544_v31 }
 0x523   :  { %1729 = vmatpush.msra.mxu2 %v1547_v27 }
 0x525   :  { %1730 = vmatpush.msra.mxu2 %v1543_v28 }
 0x55f   :  { %v1474_v36 = vpop.f32.mrf.mxu0 }
 0x560   :  { %1651 = vmatmul.f32.vlgmr.msrb.gmra.mxu2 %v1474_v36  ;;  %1691 = vmatmul.f32.vlgmr.msra.gmra.mxu0 %v1474_v36 }
 0x568   :  { %1731 = vmatmul.f32.vlgmr.msra.gmra.mxu2 %v1474_v36  ;;  %1771 = vmatmul.f32.vlgmr.msrb.gmra.mxu0 %v1474_v36 }
 0x569   :  { %v1454_v37 = vpop.f32.mrf.mxu2 }
 0x56a   :  { %1671 = vmatmul.f32.vlgmr.msrb.gmra.mxu3 %v1454_v37  ;;  %1631 = vmatmul.f32.vlgmr.msrb.gmra.mxu1 %v1454_v37 }
 0x572   :  { %1751 = vmatmul.f32.vlgmr.msra.gmra.mxu3 %v1454_v37  ;;  %1711 = vmatmul.f32.vlgmr.msra.gmra.mxu1 %v1454_v37 }
 0x5dd   :  { %v1692_v47 = vpop.f32.mrf.mxu0 }
 0x5e3   :  { %v1652_v41 = vpop.f32.mrf.mxu2 }
 0x5e5   :  { %v1772_v57 = vpop.f32.mrf.mxu0 }
 0x5e7   :  { %v1632_v40 = vpop.f32.mrf.mxu1 }
 0x5e8   :  { %v1633_v42 = vadd.f32 %v1632_v40, %v1607_v39 }
 0x5ea   :  { %v1653_v44 = vadd.f32 %v1652_v41, %v1633_v42 }
 0x5eb   :  { %v1732_v52 = vpop.f32.mrf.mxu2 }
 0x5ec   :  { %1775 = vst [vmem:[%s3255_s13] sm:$0xff] %v1653_v44 }
 0x5ed   :  { %v1672_v46 = vpop.f32.mrf.mxu3 }
 0x5ee   :  { %v1673_v48 = vadd.f32 %v1672_v46, %v1608_v43 }
 0x5ef   :  { %v1712_v49 = vpop.f32.mrf.mxu1 }
 0x5f0   :  { %v1693_v50 = vadd.f32 %v1692_v47, %v1673_v48  ;;  %v1713_v51 = vadd.f32 %v1712_v49, %v1609_v45 }
 0x5f2   :  { %1776 = vst [vmem:[%s3255_s13 + $0x8] sm:$0xff] %v1693_v50  ;;  %v1733_v54 = vadd.f32 %v1732_v52, %v1713_v51 }
 0x5f4   :  { %1777 = vst [vmem:[%s3255_s13 + $0x10] sm:$0xff] %v1733_v54 }
 0x5f5   :  { %v1752_v55 = vpop.f32.mrf.mxu3 }
 0x5f6   :  { %v1753_v56 = vadd.f32 %v1752_v55, %v1610_v53 }
 0x5f8   :  { %v1773_v58 = vadd.f32 %v1772_v57, %v1753_v56 }
 0x5fa   :  { %1778 = vst [vmem:[%s3255_s13 + $0x18] sm:$0xff] %v1773_v58 }
 0x5fb   :  { %1783 = vsyncpa [#allocation3], 1 }
 0x5fc   :  { %1784 = vsyncpa [#allocation5], 1 }
 0x5fd   :  { %1785 = vsyncpa [#allocation8], 1 }
 0x5fe   :  { %1786 = vsyncpa [#allocation11], 1 }
 0x5ff   :  { %1787 = vsyncpa [#allocation14], 1 }
 0x600   :  { %1788 = vsyncpa [#allocation17], 1 }
 0x601   :  { %1789 = vsyncpa [#allocation20], 1 }
 0x602   :  { %1790 = vsyncpa [#allocation23], 1 }

</bundles_post_ra>
